<compile_context>
chip_gen: v5e
topology: v5e:2x2
jax: 0.10.0
libtpu: 0.0.40
codegen_flags: <defaults>
</compile_context>

<pallas_src>
from functools import partial

import numpy as np
import jax
import jax.numpy as jnp
from jax import lax
from jax.experimental import pallas as pl
from jax.experimental.pallas import tpu as pltpu


# ----------------------------------------------------------------------------
# Fused HFS kernel: single grid point, all operands / intermediates in VMEM.
# Activations are (channels, batch*64) -> lane-dense (8, 128) f32 tiles.
# ----------------------------------------------------------------------------
def _hfs_kernel(hi_ref, xin_ref,
                op1_ref, b1_ref, e_ref, rtile_ref, sumsel_ref, avg_ref,
                wf1_ref, bf1_ref, wf2_ref, bf2_ref,
                amax_ref, amean_ref, bs_ref,
                w2_ref, b2_ref, m2_ref,
                o_ref, *, res_mode):
    f32 = jnp.float32
    dot = lambda a, b: jnp.dot(a, b, preferred_element_type=f32)
    c2, lanes = xin_ref.shape                      # (8, B*64) lane-dense

    # --- stage 1: folded resize -> fuse_conv1 -> BN -> ReLU (batch on lanes) -
    y = jnp.maximum(dot(op1_ref[...], hi_ref[...]) + b1_ref[...], 0.0)  # (c2*4, B)
    # bilinear 2x2 -> 8x8 upsample, moving batch onto the lane axis:
    #   x8[c, b*64+s] = sum_q y[c*4+q, b] * RUT[q, s]
    g = dot(y, e_ref[...])                                     # (c2*4, B*64)
    x8 = dot(sumsel_ref[...], g * rtile_ref[...])              # (c2,   B*64)

    # --- CBAM channel attention ---------------------------------------------
    m = dot(x8, avg_ref[...])                                  # (c2,  B) per-image mean
    h = jnp.maximum(dot(wf1_ref[...], m) + bf1_ref[...], 0.0)  # (crp, B)
    gate = jax.nn.sigmoid(dot(wf2_ref[...], h) + bf2_ref[...]) # (c2,  B)
    xca = dot(gate, e_ref[...]) * x8                           # (c2, B*64)

    # --- CBAM spatial attention (ChannelPool + folded 7x7 conv + BN) ---------
    mx = jnp.max(xca, axis=0, keepdims=True)                   # (1, B*64)
    mn = jnp.mean(xca, axis=0, keepdims=True)                  # (1, B*64)
    s = dot(mx, amax_ref[...]) + dot(mn, amean_ref[...]) + bs_ref[...]
    hi_att = jax.nn.sigmoid(s) * xca                           # (c2, B*64)

    # --- fuse_conv2: 3x3 pad=1 conv + BN + ReLU -------------------------------
    # split-K halves stacked on sublanes, all 9 tap weights in one matmul,
    # per-tap shifts via pltpu.roll (XLU) + precomputed validity masks.
    x2 = jnp.concatenate([hi_att, xin_ref[...]], axis=0)       # (2*c2, B*64)
    ytaps = dot(w2_ref[...], x2)                               # (9*c2, B*64)
    acc = jnp.zeros((c2, lanes), f32)
    for t in range(9):
        kh, kw = t // 3, t % 3
        delta = (kh - 1) * 8 + (kw - 1)                        # lane offset of source
        yt = ytaps[t * c2:(t + 1) * c2, :]
        if delta != 0:
            # result[:, p] = yt[:, p + delta]; wrapped lanes are invalid sources
            # and are zeroed by the mask below.
            yt = pltpu.roll(yt, (-delta) % lanes, axis=1)
        acc = acc + yt * m2_ref[t]
    out = jnp.maximum(acc + b2_ref[...], 0.0)
    if res_mode == 1:                                          # residual fused here
        out = out + xin_ref[...]
    o_ref[...] = out                                           # single lane-dense store


# ----------------------------------------------------------------------------
# Host-side operator / weight preparation (numpy, done once)
# ----------------------------------------------------------------------------
def _bilinear_matrix(in_size, out_size):
    """F.interpolate(mode='bilinear', align_corners=False) as (out, in) matrix."""
    scale = in_size / out_size
    W = np.zeros((out_size, in_size), np.float32)
    for o in range(out_size):
        src = (o + 0.5) * scale - 0.5
        src = max(src, 0.0)
        i0 = min(int(np.floor(src)), in_size - 1)
        i1 = min(i0 + 1, in_size - 1)
        l1 = src - i0
        W[o, i0] += 1.0 - l1
        W[o, i1] += l1
    return W


def _resize_matrix(in_h, in_w, out_h, out_w):
    """(out_h*out_w, in_h*in_w) separable bilinear resize operator."""
    return np.kron(_bilinear_matrix(in_h, out_h),
                   _bilinear_matrix(in_w, out_w)).astype(np.float32)


def _fold_bn(w, b, bn, eps=1e-5):
    """Fold eval-mode BatchNorm into conv weight/bias."""
    g = np.asarray(bn['g'], np.float32)
    beta = np.asarray(bn['b'], np.float32)
    m = np.asarray(bn['m'], np.float32)
    v = np.asarray(bn['v'], np.float32)
    s = g / np.sqrt(v + eps)
    wf = np.asarray(w, np.float32) * s[:, None, None, None]
    bf = (np.asarray(b, np.float32) - m) * s + beta
    return wf, bf


def _spatial_conv_ops(w_sp, H, W):
    """Fold the 7x7 (2->1, pad=3, no-bias) conv into two dense (H*W, H*W) operators."""
    k = w_sp.shape[-1]
    pad = (k - 1) // 2
    A = np.zeros((2, H * W, H * W), np.float32)
    for c in range(2):
        for oh in range(H):
            for ow in range(W):
                p = oh * W + ow
                for kh in range(k):
                    for kw in range(k):
                        ih, iw = oh + kh - pad, ow + kw - pad
                        if 0 <= ih < H and 0 <= iw < W:
                            A[c, ih * W + iw, p] += w_sp[0, c, kh, kw]
    return A[0], A[1]


def _conv_shift_masks(H, W, k, pad, batch):
    """mask[t, 0, b*H*W + oh*W + ow] = 1 iff tap source (oh+kh-pad, ow+kw-pad) is valid."""
    M = np.zeros((k * k, 1, batch * H * W), np.float32)
    for kh in range(k):
        for kw in range(k):
            t = kh * k + kw
            for oh in range(H):
                for ow in range(W):
                    ih, iw = oh + kh - pad, ow + kw - pad
                    if 0 <= ih < H and 0 <= iw < W:
                        for b in range(batch):
                            M[t, 0, b * H * W + oh * W + ow] = 1.0
    return M


def prepare_hfs(p, hi3_shape, hi6_shape, batch):
    """Build all folded weights / operator matrices consumed by the fused kernel."""
    c0, H3, W3 = hi3_shape[1], hi3_shape[2], hi3_shape[3]
    c1, H6, W6 = hi6_shape[1], hi6_shape[2], hi6_shape[3]
    c2 = int(np.asarray(p['fc2_b']).shape[0])
    cr = int(np.asarray(p['att_fc1_b']).shape[0])
    B, HW = batch, 64
    f32 = np.float32

    R3 = _resize_matrix(H3, W3, 4, 4)                    # (16, H3*W3)
    R6 = _resize_matrix(H6, W6, 4, 4)                    # (16, H6*W6)
    RUT = _resize_matrix(2, 2, 8, 8).T.astype(f32)       # (4, 64)

    # stage-1 fold: resize -> 3x3 valid conv -> BN, one (c2*4, K) operator
    w1f, b1f = _fold_bn(p['fc1_w'], p['fc1_b'], p['bn1'])
    K = c0 * H3 * W3 + c1 * H6 * W6
    OP1T = np.zeros((c2 * 4, K), f32)
    for co in range(c2):
        for oh in range(2):
            for ow in range(2):
                row = co * 4 + oh * 2 + ow
                for kh in range(3):
                    for kw in range(3):
                        p4 = (oh + kh) * 4 + (ow + kw)
                        for ci in range(c0):
                            OP1T[row, ci * H3 * W3:(ci + 1) * H3 * W3] += \
                                w1f[co, ci, kh, kw] * R3[p4]
                        for ci in range(c1):
                            off = c0 * H3 * W3 + ci * H6 * W6
                            OP1T[row, off:off + H6 * W6] += \
                                w1f[co, c0 + ci, kh, kw] * R6[p4]
    b1col = np.repeat(b1f.astype(f32), 4).reshape(c2 * 4, 1)

    # upsample / broadcast / reduce helper operators
    E = np.kron(np.eye(B, dtype=f32), np.ones((1, HW), f32))              # (B, B*64)
    RTILE = np.tile(RUT, (c2, B))                                         # (c2*4, B*64)
    SUMSEL = np.kron(np.eye(c2, dtype=f32), np.ones((1, 4), f32))         # (c2, c2*4)
    AVG = np.kron(np.eye(B, dtype=f32), np.full((HW, 1), 1.0 / HW, f32))  # (B*64, B)

    # CBAM channel attention, hidden dim zero-padded to a full sublane group
    crp = max(8, ((cr + 7) // 8) * 8)
    Wf1 = np.zeros((crp, c2), f32)
    Wf1[:cr] = np.asarray(p['att_fc1_w'], f32).reshape(cr, c2)
    bf1 = np.zeros((crp, 1), f32)
    bf1[:cr, 0] = np.asarray(p['att_fc1_b'], f32)
    Wf2 = np.zeros((c2, crp), f32)
    Wf2[:, :cr] = np.asarray(p['att_fc2_w'], f32).reshape(c2, cr)
    bf2 = np.asarray(p['att_fc2_b'], f32).reshape(c2, 1)

    # CBAM spatial 7x7 conv + BN folded into block-diagonal (B*64, B*64) operators
    g = float(np.asarray(p['bns']['g'])[0]); beta = float(np.asarray(p['bns']['b'])[0])
    mu = float(np.asarray(p['bns']['m'])[0]); var = float(np.asarray(p['bns']['v'])[0])
    s_scale = g / float(np.sqrt(var + 1e-5))
    Amax64, Amean64 = _spatial_conv_ops(np.asarray(p['att_sp_w'], f32), 8, 8)
    Amax = np.kron(np.eye(B, dtype=f32), (Amax64 * s_scale).astype(f32))
    Amean = np.kron(np.eye(B, dtype=f32), (Amean64 * s_scale).astype(f32))
    bs = np.array([[beta - mu * s_scale]], f32)

    # fuse_conv2 (3x3, pad 1) + BN: 9 tap weights stacked on sublanes
    w2f, b2f = _fold_bn(p['fc2_w'], p['fc2_b'], p['bn2'])
    W2 = np.zeros((9 * c2, 2 * c2), f32)
    for kh in range(3):
        for kw in range(3):
            t = kh * 3 + kw
            W2[t * c2:(t + 1) * c2, :] = w2f[:, :, kh, kw]
    b2col = b2f.reshape(c2, 1).astype(f32)
    M2 = _conv_shift_masks(8, 8, 3, 1, B)                # (9, 1, B*64)

    prep = dict(OP1T=OP1T, b1=b1col, E=E, RTILE=RTILE, SUMSEL=SUMSEL, AVG=AVG,
                Wf1=Wf1, bf1=bf1, Wf2=Wf2, bf2=bf2,
                Amax=Amax, Amean=Amean, bs=bs,
                W2=W2, b2=b2col, M2=M2)
    return {k: jnp.asarray(v, jnp.float32) for k, v in prep.items()}


# ----------------------------------------------------------------------------
# Forward (single fused pallas_call; wrapper does only layout plumbing)
# ----------------------------------------------------------------------------
@partial(jax.jit, static_argnames=("res_mode",))
def hfs_forward(hi3, hi6, x_in, prep, res_mode=0):
    B, c2, H, W = x_in.shape
    assert (H, W) == (8, 8), "HFS fuses at the module's fixed 8x8 resolution"
    KHW = B * H * W
    # lane-dense x_in: (c2, B*64)
    xin_ld = jnp.transpose(x_in, (1, 0, 2, 3)).reshape(c2, KHW)
    # stage-1 input: per-image flattened [hi3 | hi6] features, batch on lanes
    hi_t = jnp.transpose(jnp.concatenate(
        [hi3.reshape(B, -1), hi6.reshape(B, -1)], axis=1))                # (K, B)

    flops = 2 * (prep['OP1T'].size * B          # stage-1 fold
                 + prep['RTILE'].size * B       # upsample broadcast
                 + prep['SUMSEL'].size * KHW    # upsample fold
                 + prep['AVG'].size * c2        # channel mean
                 + (prep['Wf1'].size + prep['Wf2'].size) * B
                 + prep['E'].size * c2          # gate broadcast
                 + prep['Amax'].size + prep['Amean'].size
                 + prep['W2'].size * KHW)       # fuse_conv2
    transcendentals = 2 * (c2 * B + KHW)
    bytes_accessed = 4 * (hi_t.size + xin_ld.size + c2 * KHW
                          + sum(int(v.size) for v in prep.values()))

    out = pl.pallas_call(
        partial(_hfs_kernel, res_mode=res_mode),
        out_shape=jax.ShapeDtypeStruct((c2, KHW), jnp.float32),
        cost_estimate=pl.CostEstimate(flops=int(flops),
                                      transcendentals=int(transcendentals),
                                      bytes_accessed=int(bytes_accessed)),
    )(hi_t, xin_ld,
      prep['OP1T'], prep['b1'], prep['E'], prep['RTILE'], prep['SUMSEL'],
      prep['AVG'], prep['Wf1'], prep['bf1'], prep['Wf2'], prep['bf2'],
      prep['Amax'], prep['Amean'], prep['bs'],
      prep['W2'], prep['b2'], prep['M2'])
    return jnp.transpose(out.reshape(c2, B, H, W), (1, 0, 2, 3))


# ----------------------------------------------------------------------------
# Pure-JAX (XLA) reference, same eval-mode BN semantics (for self-checking)
# ----------------------------------------------------------------------------
def _bn_eval(x, bn, eps=1e-5):
    g = bn['g'][None, :, None, None]; b = bn['b'][None, :, None, None]
    m = bn['m'][None, :, None, None]; v = bn['v'][None, :, None, None]
    return (x - m) / jnp.sqrt(v + eps) * g + b


def _conv2d_ref(x, w, b=None, pad=0):
    dn = lax.conv_dimension_numbers(x.shape, w.shape, ('NCHW', 'OIHW', 'NCHW'))
    y = lax.conv_general_dilated(x, w, (1, 1), [(pad, pad), (pad, pad)],
                                 dimension_numbers=dn,
                                 precision=lax.Precision.HIGHEST)
    if b is not None:
        y = y + b[None, :, None, None]
    return y


def _resize_ref(x, mat, oh, ow):
    B, C = x.shape[0], x.shape[1]
    y = jnp.matmul(x.reshape(B, C, -1), jnp.asarray(mat.T),
                   precision=lax.Precision.HIGHEST)
    return y.reshape(B, C, oh, ow)


def hfs_reference(hi3, hi6, x_in, p, res_mode=0):
    R3 = _resize_matrix(hi3.shape[2], hi3.shape[3], 4, 4)
    R6 = _resize_matrix(hi6.shape[2], hi6.shape[3], 4, 4)
    RU = _resize_matrix(2, 2, 8, 8)
    hi3_4 = _resize_ref(hi3, R3, 4, 4)
    hi6_4 = _resize_ref(hi6, R6, 4, 4)
    h = jnp.concatenate([hi3_4, hi6_4], axis=1)
    h = jax.nn.relu(_bn_eval(_conv2d_ref(h, p['fc1_w'], p['fc1_b'], pad=0), p['bn1']))
    h = _resize_ref(h, RU, 8, 8)
    m = h.mean(axis=(2, 3), keepdims=True)
    a = jax.nn.relu(_conv2d_ref(m, p['att_fc1_w'], p['att_fc1_b']))
    a = _conv2d_ref(a, p['att_fc2_w'], p['att_fc2_b'])
    xca = jax.nn.sigmoid(a) * h
    pooled = jnp.concatenate([xca.max(axis=1, keepdims=True),
                              xca.mean(axis=1, keepdims=True)], axis=1)
    s = _bn_eval(_conv2d_ref(pooled, p['att_sp_w'], None, pad=3), p['bns'])
    hi_att = jax.nn.sigmoid(s) * xca
    cat2 = jnp.concatenate([hi_att, x_in], axis=1)
    out = jax.nn.relu(_bn_eval(_conv2d_ref(cat2, p['fc2_w'], p['fc2_b'], pad=1), p['bn2']))
    if res_mode == 1:
        out = out + x_in
    return out


# ----------------------------------------------------------------------------
# Deterministic parameter initialization (synthetic, no checkpoint)
# ----------------------------------------------------------------------------
def init_params(key, c0, c1, c2):
    ks = jax.random.split(key, 24)
    nrm = lambda k, shape, s=0.2: jax.random.normal(k, shape, jnp.float32) * s
    bn = lambda kg, kb, km, kv, n: dict(
        g=1.0 + nrm(kg, (n,), 0.1), b=nrm(kb, (n,), 0.1),
        m=nrm(km, (n,), 0.1), v=1.0 + jnp.abs(nrm(kv, (n,), 0.1)))
    cr = c2 // 4
    return {
        'fc1_w': nrm(ks[0], (c2, c0 + c1, 3, 3)),
        'fc1_b': nrm(ks[1], (c2,), 0.1),
        'bn1': bn(ks[2], ks[3], ks[4], ks[5], c2),
        'att_fc1_w': nrm(ks[6], (cr, c2, 1, 1)),
        'att_fc1_b': nrm(ks[7], (cr,), 0.1),
        'att_fc2_w': nrm(ks[8], (c2, cr, 1, 1)),
        'att_fc2_b': nrm(ks[9], (c2,), 0.1),
        'att_sp_w': nrm(ks[10], (1, 2, 7, 7)),
        'bns': bn(ks[11], ks[12], ks[13], ks[14], 1),
        'fc2_w': nrm(ks[15], (c2, 2 * c2, 3, 3)),
        'fc2_b': nrm(ks[16], (c2,), 0.1),
        'bn2': bn(ks[17], ks[18], ks[19], ks[20], c2),
    }


if __name__ == "__main__":
    key = jax.random.PRNGKey(0)
    k_hi3, k_hi6, k_xin, k_par = jax.random.split(key, 4)

    B, c0, c1, c2 = 2, 4, 4, 8
    hi3 = jax.random.normal(k_hi3, (B, c0, 16, 16), jnp.float32)   # x[0]
    hi6 = jax.random.normal(k_hi6, (B, c1, 8, 8), jnp.float32)     # x[1]
    x_in = jax.random.normal(k_xin, (B, c2, 8, 8), jnp.float32)    # x[2]

    params = init_params(k_par, c0, c1, c2)
    prep = prepare_hfs(params, hi3.shape, hi6.shape, B)

    for rm in (0, 1):
        out = jax.block_until_ready(hfs_forward(hi3, hi6, x_in, prep, res_mode=rm))
        assert out.shape == (B, c2, 8, 8), out.shape
        assert bool(jnp.all(jnp.isfinite(out)))
        ref = jax.block_until_ready(hfs_reference(hi3, hi6, x_in, params, res_mode=rm))
        err = float(jnp.max(jnp.abs(out - ref)))
        # all-f32 path with folded operators: observed error ~1e-5; 5e-3 also
        # guards future bf16-operand refactors from silently degrading accuracy
        assert err < 5e-3, f"res_mode={rm}: kernel/reference mismatch, max abs err = {err}"

    print("KERNEL_OK")
</pallas_src>

<mosaic_0001>
module attributes {stable_mosaic.version = 11 : i64} {
  func.func @_hfs_kernel(%arg0: memref<1280x2xf32, #tpu.memory_space<vmem>>, %arg1: memref<8x128xf32, #tpu.memory_space<vmem>>, %arg2: memref<32x1280xf32, #tpu.memory_space<vmem>>, %arg3: memref<32x1xf32, #tpu.memory_space<vmem>>, %arg4: memref<2x128xf32, #tpu.memory_space<vmem>>, %arg5: memref<32x128xf32, #tpu.memory_space<vmem>>, %arg6: memref<8x32xf32, #tpu.memory_space<vmem>>, %arg7: memref<128x2xf32, #tpu.memory_space<vmem>>, %arg8: memref<8x8xf32, #tpu.memory_space<vmem>>, %arg9: memref<8x1xf32, #tpu.memory_space<vmem>>, %arg10: memref<8x8xf32, #tpu.memory_space<vmem>>, %arg11: memref<8x1xf32, #tpu.memory_space<vmem>>, %arg12: memref<128x128xf32, #tpu.memory_space<vmem>>, %arg13: memref<128x128xf32, #tpu.memory_space<vmem>>, %arg14: memref<1x1xf32, #tpu.memory_space<vmem>>, %arg15: memref<72x16xf32, #tpu.memory_space<vmem>>, %arg16: memref<8x1xf32, #tpu.memory_space<vmem>>, %arg17: memref<9x1x128xf32, #tpu.memory_space<vmem>>, %arg18: memref<8x128xf32, #tpu.memory_space<vmem>>) attributes {dimension_semantics = [], scalar_prefetch = 0 : i64, scratch_operands = 0 : i64, tpu.core_type = #tpu.core_type<tc>} {
    %c0 = arith.constant 0 : index
    %c0_0 = arith.constant 0 : index
    %0 = vector.load %arg2[%c0, %c0_0] : memref<32x1280xf32, #tpu.memory_space<vmem>>, vector<32x1280xf32>
    %c0_1 = arith.constant 0 : index
    %c0_2 = arith.constant 0 : index
    %1 = vector.load %arg0[%c0_1, %c0_2] : memref<1280x2xf32, #tpu.memory_space<vmem>>, vector<1280x2xf32>
    %cst = arith.constant dense<0.000000e+00> : vector<32x2xf32>
    %2 = tpu.matmul %0, %1, %cst {dimension_numbers = #tpu.dot_dimension_numbers<[1], [0], [0], [1], [0, 0, 1, 1], [], []>} : vector<32x1280xf32>, vector<1280x2xf32>, vector<32x2xf32> -> vector<32x2xf32>
    %c0_3 = arith.constant 0 : index
    %c0_4 = arith.constant 0 : index
    %3 = vector.load %arg3[%c0_3, %c0_4] : memref<32x1xf32, #tpu.memory_space<vmem>>, vector<32x1xf32>
    %4 = vector.broadcast %3 : vector<32x1xf32> to vector<32x2xf32>
    %5 = arith.addf %2, %4 : vector<32x2xf32>
    %cst_5 = arith.constant 0.000000e+00 : f32
    %6 = vector.broadcast %cst_5 : f32 to vector<32x2xf32>
    %7 = arith.maximumf %5, %6 : vector<32x2xf32>
    %c0_6 = arith.constant 0 : index
    %c0_7 = arith.constant 0 : index
    %8 = vector.load %arg4[%c0_6, %c0_7] : memref<2x128xf32, #tpu.memory_space<vmem>>, vector<2x128xf32>
    %cst_8 = arith.constant dense<0.000000e+00> : vector<32x128xf32>
    %9 = tpu.matmul %7, %8, %cst_8 {dimension_numbers = #tpu.dot_dimension_numbers<[1], [0], [0], [1], [0, 0, 1, 1], [], []>} : vector<32x2xf32>, vector<2x128xf32>, vector<32x128xf32> -> vector<32x128xf32>
    %c0_9 = arith.constant 0 : index
    %c0_10 = arith.constant 0 : index
    %10 = vector.load %arg6[%c0_9, %c0_10] : memref<8x32xf32, #tpu.memory_space<vmem>>, vector<8x32xf32>
    %c0_11 = arith.constant 0 : index
    %c0_12 = arith.constant 0 : index
    %11 = vector.load %arg5[%c0_11, %c0_12] : memref<32x128xf32, #tpu.memory_space<vmem>>, vector<32x128xf32>
    %12 = arith.mulf %9, %11 : vector<32x128xf32>
    %cst_13 = arith.constant dense<0.000000e+00> : vector<8x128xf32>
    %13 = tpu.matmul %10, %12, %cst_13 {dimension_numbers = #tpu.dot_dimension_numbers<[1], [0], [0], [1], [0, 0, 1, 1], [], []>} : vector<8x32xf32>, vector<32x128xf32>, vector<8x128xf32> -> vector<8x128xf32>
    %c0_14 = arith.constant 0 : index
    %c0_15 = arith.constant 0 : index
    %14 = vector.load %arg7[%c0_14, %c0_15] : memref<128x2xf32, #tpu.memory_space<vmem>>, vector<128x2xf32>
    %cst_16 = arith.constant dense<0.000000e+00> : vector<8x2xf32>
    %15 = tpu.matmul %13, %14, %cst_16 {dimension_numbers = #tpu.dot_dimension_numbers<[1], [0], [0], [1], [0, 0, 1, 1], [], []>} : vector<8x128xf32>, vector<128x2xf32>, vector<8x2xf32> -> vector<8x2xf32>
    %c0_17 = arith.constant 0 : index
    %c0_18 = arith.constant 0 : index
    %16 = vector.load %arg8[%c0_17, %c0_18] : memref<8x8xf32, #tpu.memory_space<vmem>>, vector<8x8xf32>
    %cst_19 = arith.constant dense<0.000000e+00> : vector<8x2xf32>
    %17 = tpu.matmul %16, %15, %cst_19 {dimension_numbers = #tpu.dot_dimension_numbers<[1], [0], [0], [1], [0, 0, 1, 1], [], []>} : vector<8x8xf32>, vector<8x2xf32>, vector<8x2xf32> -> vector<8x2xf32>
    %c0_20 = arith.constant 0 : index
    %c0_21 = arith.constant 0 : index
    %18 = vector.load %arg9[%c0_20, %c0_21] : memref<8x1xf32, #tpu.memory_space<vmem>>, vector<8x1xf32>
    %19 = vector.broadcast %18 : vector<8x1xf32> to vector<8x2xf32>
    %20 = arith.addf %17, %19 : vector<8x2xf32>
    %cst_22 = arith.constant 0.000000e+00 : f32
    %21 = vector.broadcast %cst_22 : f32 to vector<8x2xf32>
    %22 = arith.maximumf %20, %21 : vector<8x2xf32>
    %c0_23 = arith.constant 0 : index
    %c0_24 = arith.constant 0 : index
    %23 = vector.load %arg10[%c0_23, %c0_24] : memref<8x8xf32, #tpu.memory_space<vmem>>, vector<8x8xf32>
    %cst_25 = arith.constant dense<0.000000e+00> : vector<8x2xf32>
    %24 = tpu.matmul %23, %22, %cst_25 {dimension_numbers = #tpu.dot_dimension_numbers<[1], [0], [0], [1], [0, 0, 1, 1], [], []>} : vector<8x8xf32>, vector<8x2xf32>, vector<8x2xf32> -> vector<8x2xf32>
    %c0_26 = arith.constant 0 : index
    %c0_27 = arith.constant 0 : index
    %25 = vector.load %arg11[%c0_26, %c0_27] : memref<8x1xf32, #tpu.memory_space<vmem>>, vector<8x1xf32>
    %26 = vector.broadcast %25 : vector<8x1xf32> to vector<8x2xf32>
    %27 = arith.addf %24, %26 : vector<8x2xf32>
    %28 = arith.negf %27 : vector<8x2xf32>
    %29 = math.exp %28 : vector<8x2xf32>
    %cst_28 = arith.constant 1.000000e+00 : f32
    %30 = vector.broadcast %cst_28 : f32 to vector<8x2xf32>
    %31 = arith.addf %30, %29 : vector<8x2xf32>
    %32 = arith.divf %30, %31 : vector<8x2xf32>
    %c0_29 = arith.constant 0 : index
    %c0_30 = arith.constant 0 : index
    %33 = vector.load %arg4[%c0_29, %c0_30] : memref<2x128xf32, #tpu.memory_space<vmem>>, vector<2x128xf32>
    %cst_31 = arith.constant dense<0.000000e+00> : vector<8x128xf32>
    %34 = tpu.matmul %32, %33, %cst_31 {dimension_numbers = #tpu.dot_dimension_numbers<[1], [0], [0], [1], [0, 0, 1, 1], [], []>} : vector<8x2xf32>, vector<2x128xf32>, vector<8x128xf32> -> vector<8x128xf32>
    %35 = arith.mulf %34, %13 : vector<8x128xf32>
    %cst_32 = arith.constant dense<0xFF800000> : vector<128xf32>
    %36 = vector.multi_reduction <maximumf>, %35, %cst_32 [0] : vector<8x128xf32> to vector<128xf32>
    %37 = vector.shape_cast %36 : vector<128xf32> to vector<1x128xf32>
    %cst_33 = arith.constant dense<0.000000e+00> : vector<128xf32>
    %38 = vector.multi_reduction <add>, %35, %cst_33 [0] : vector<8x128xf32> to vector<128xf32>
    %39 = vector.shape_cast %38 : vector<128xf32> to vector<1x128xf32>
    %cst_34 = arith.constant 8.000000e+00 : f32
    %40 = vector.broadcast %cst_34 : f32 to vector<1x128xf32>
    %41 = arith.divf %39, %40 : vector<1x128xf32>
    %c0_35 = arith.constant 0 : index
    %c0_36 = arith.constant 0 : index
    %42 = vector.load %arg12[%c0_35, %c0_36] : memref<128x128xf32, #tpu.memory_space<vmem>>, vector<128x128xf32>
    %cst_37 = arith.constant dense<0.000000e+00> : vector<1x128xf32>
    %43 = tpu.matmul %37, %42, %cst_37 {dimension_numbers = #tpu.dot_dimension_numbers<[1], [0], [0], [1], [0, 0, 1, 1], [], []>} : vector<1x128xf32>, vector<128x128xf32>, vector<1x128xf32> -> vector<1x128xf32>
    %c0_38 = arith.constant 0 : index
    %c0_39 = arith.constant 0 : index
    %44 = vector.load %arg13[%c0_38, %c0_39] : memref<128x128xf32, #tpu.memory_space<vmem>>, vector<128x128xf32>
    %cst_40 = arith.constant dense<0.000000e+00> : vector<1x128xf32>
    %45 = tpu.matmul %41, %44, %cst_40 {dimension_numbers = #tpu.dot_dimension_numbers<[1], [0], [0], [1], [0, 0, 1, 1], [], []>} : vector<1x128xf32>, vector<128x128xf32>, vector<1x128xf32> -> vector<1x128xf32>
    %46 = arith.addf %43, %45 : vector<1x128xf32>
    %c0_41 = arith.constant 0 : index
    %c0_42 = arith.constant 0 : index
    %47 = vector.load %arg14[%c0_41, %c0_42] : memref<1x1xf32, #tpu.memory_space<vmem>>, vector<1x1xf32>
    %48 = vector.broadcast %47 : vector<1x1xf32> to vector<1x128xf32>
    %49 = arith.addf %46, %48 : vector<1x128xf32>
    %50 = arith.negf %49 : vector<1x128xf32>
    %51 = math.exp %50 : vector<1x128xf32>
    %cst_43 = arith.constant 1.000000e+00 : f32
    %52 = vector.broadcast %cst_43 : f32 to vector<1x128xf32>
    %53 = arith.addf %52, %51 : vector<1x128xf32>
    %54 = arith.divf %52, %53 : vector<1x128xf32>
    %55 = vector.broadcast %54 : vector<1x128xf32> to vector<8x128xf32>
    %56 = arith.mulf %55, %35 : vector<8x128xf32>
    %c0_44 = arith.constant 0 : index
    %c0_45 = arith.constant 0 : index
    %57 = vector.load %arg1[%c0_44, %c0_45] : memref<8x128xf32, #tpu.memory_space<vmem>>, vector<8x128xf32>
    %58 = tpu.concatenate %56, %57 in 0 : vector<8x128xf32>, vector<8x128xf32> -> vector<16x128xf32>
    %c0_46 = arith.constant 0 : index
    %c0_47 = arith.constant 0 : index
    %59 = vector.load %arg15[%c0_46, %c0_47] : memref<72x16xf32, #tpu.memory_space<vmem>>, vector<72x16xf32>
    %cst_48 = arith.constant dense<0.000000e+00> : vector<72x128xf32>
    %60 = tpu.matmul %59, %58, %cst_48 {dimension_numbers = #tpu.dot_dimension_numbers<[1], [0], [0], [1], [0, 0, 1, 1], [], []>} : vector<72x16xf32>, vector<16x128xf32>, vector<72x128xf32> -> vector<72x128xf32>
    %cst_49 = arith.constant 0.000000e+00 : f32
    %61 = vector.broadcast %cst_49 : f32 to vector<8x128xf32>
    %62 = vector.extract_strided_slice %60 {offsets = [0, 0], sizes = [8, 128], strides = [1, 1]} : vector<72x128xf32> to vector<8x128xf32>
    %c9_i32 = arith.constant 9 : i32
    %63 = tpu.dynamic_rotate %62 by %c9_i32 dim 1 : vector<8x128xf32>, i32 -> vector<8x128xf32>
    %c0_50 = arith.constant 0 : index
    %c0_51 = arith.constant 0 : index
    %c0_52 = arith.constant 0 : index
    %64 = vector.load %arg17[%c0_50, %c0_51, %c0_52] : memref<9x1x128xf32, #tpu.memory_space<vmem>>, vector<1x1x128xf32>
    %65 = vector.shape_cast %64 : vector<1x1x128xf32> to vector<1x128xf32>
    %66 = vector.broadcast %65 : vector<1x128xf32> to vector<8x128xf32>
    %67 = arith.mulf %63, %66 : vector<8x128xf32>
    %68 = arith.addf %61, %67 : vector<8x128xf32>
    %69 = vector.extract_strided_slice %60 {offsets = [8, 0], sizes = [8, 128], strides = [1, 1]} : vector<72x128xf32> to vector<8x128xf32>
    %c8_i32 = arith.constant 8 : i32
    %70 = tpu.dynamic_rotate %69 by %c8_i32 dim 1 : vector<8x128xf32>, i32 -> vector<8x128xf32>
    %c1 = arith.constant 1 : index
    %c0_53 = arith.constant 0 : index
    %c0_54 = arith.constant 0 : index
    %71 = vector.load %arg17[%c1, %c0_53, %c0_54] : memref<9x1x128xf32, #tpu.memory_space<vmem>>, vector<1x1x128xf32>
    %72 = vector.shape_cast %71 : vector<1x1x128xf32> to vector<1x128xf32>
    %73 = vector.broadcast %72 : vector<1x128xf32> to vector<8x128xf32>
    %74 = arith.mulf %70, %73 : vector<8x128xf32>
    %75 = arith.addf %68, %74 : vector<8x128xf32>
    %76 = vector.extract_strided_slice %60 {offsets = [16, 0], sizes = [8, 128], strides = [1, 1]} : vector<72x128xf32> to vector<8x128xf32>
    %c7_i32 = arith.constant 7 : i32
    %77 = tpu.dynamic_rotate %76 by %c7_i32 dim 1 : vector<8x128xf32>, i32 -> vector<8x128xf32>
    %c2 = arith.constant 2 : index
    %c0_55 = arith.constant 0 : index
    %c0_56 = arith.constant 0 : index
    %78 = vector.load %arg17[%c2, %c0_55, %c0_56] : memref<9x1x128xf32, #tpu.memory_space<vmem>>, vector<1x1x128xf32>
    %79 = vector.shape_cast %78 : vector<1x1x128xf32> to vector<1x128xf32>
    %80 = vector.broadcast %79 : vector<1x128xf32> to vector<8x128xf32>
    %81 = arith.mulf %77, %80 : vector<8x128xf32>
    %82 = arith.addf %75, %81 : vector<8x128xf32>
    %83 = vector.extract_strided_slice %60 {offsets = [24, 0], sizes = [8, 128], strides = [1, 1]} : vector<72x128xf32> to vector<8x128xf32>
    %c1_i32 = arith.constant 1 : i32
    %84 = tpu.dynamic_rotate %83 by %c1_i32 dim 1 : vector<8x128xf32>, i32 -> vector<8x128xf32>
    %c3 = arith.constant 3 : index
    %c0_57 = arith.constant 0 : index
    %c0_58 = arith.constant 0 : index
    %85 = vector.load %arg17[%c3, %c0_57, %c0_58] : memref<9x1x128xf32, #tpu.memory_space<vmem>>, vector<1x1x128xf32>
    %86 = vector.shape_cast %85 : vector<1x1x128xf32> to vector<1x128xf32>
    %87 = vector.broadcast %86 : vector<1x128xf32> to vector<8x128xf32>
    %88 = arith.mulf %84, %87 : vector<8x128xf32>
    %89 = arith.addf %82, %88 : vector<8x128xf32>
    %90 = vector.extract_strided_slice %60 {offsets = [32, 0], sizes = [8, 128], strides = [1, 1]} : vector<72x128xf32> to vector<8x128xf32>
    %c4 = arith.constant 4 : index
    %c0_59 = arith.constant 0 : index
    %c0_60 = arith.constant 0 : index
    %91 = vector.load %arg17[%c4, %c0_59, %c0_60] : memref<9x1x128xf32, #tpu.memory_space<vmem>>, vector<1x1x128xf32>
    %92 = vector.shape_cast %91 : vector<1x1x128xf32> to vector<1x128xf32>
    %93 = vector.broadcast %92 : vector<1x128xf32> to vector<8x128xf32>
    %94 = arith.mulf %90, %93 : vector<8x128xf32>
    %95 = arith.addf %89, %94 : vector<8x128xf32>
    %96 = vector.extract_strided_slice %60 {offsets = [40, 0], sizes = [8, 128], strides = [1, 1]} : vector<72x128xf32> to vector<8x128xf32>
    %c127_i32 = arith.constant 127 : i32
    %97 = tpu.dynamic_rotate %96 by %c127_i32 dim 1 : vector<8x128xf32>, i32 -> vector<8x128xf32>
    %c5 = arith.constant 5 : index
    %c0_61 = arith.constant 0 : index
    %c0_62 = arith.constant 0 : index
    %98 = vector.load %arg17[%c5, %c0_61, %c0_62] : memref<9x1x128xf32, #tpu.memory_space<vmem>>, vector<1x1x128xf32>
    %99 = vector.shape_cast %98 : vector<1x1x128xf32> to vector<1x128xf32>
    %100 = vector.broadcast %99 : vector<1x128xf32> to vector<8x128xf32>
    %101 = arith.mulf %97, %100 : vector<8x128xf32>
    %102 = arith.addf %95, %101 : vector<8x128xf32>
    %103 = vector.extract_strided_slice %60 {offsets = [48, 0], sizes = [8, 128], strides = [1, 1]} : vector<72x128xf32> to vector<8x128xf32>
    %c121_i32 = arith.constant 121 : i32
    %104 = tpu.dynamic_rotate %103 by %c121_i32 dim 1 : vector<8x128xf32>, i32 -> vector<8x128xf32>
    %c6 = arith.constant 6 : index
    %c0_63 = arith.constant 0 : index
    %c0_64 = arith.constant 0 : index
    %105 = vector.load %arg17[%c6, %c0_63, %c0_64] : memref<9x1x128xf32, #tpu.memory_space<vmem>>, vector<1x1x128xf32>
    %106 = vector.shape_cast %105 : vector<1x1x128xf32> to vector<1x128xf32>
    %107 = vector.broadcast %106 : vector<1x128xf32> to vector<8x128xf32>
    %108 = arith.mulf %104, %107 : vector<8x128xf32>
    %109 = arith.addf %102, %108 : vector<8x128xf32>
    %110 = vector.extract_strided_slice %60 {offsets = [56, 0], sizes = [8, 128], strides = [1, 1]} : vector<72x128xf32> to vector<8x128xf32>
    %c120_i32 = arith.constant 120 : i32
    %111 = tpu.dynamic_rotate %110 by %c120_i32 dim 1 : vector<8x128xf32>, i32 -> vector<8x128xf32>
    %c7 = arith.constant 7 : index
    %c0_65 = arith.constant 0 : index
    %c0_66 = arith.constant 0 : index
    %112 = vector.load %arg17[%c7, %c0_65, %c0_66] : memref<9x1x128xf32, #tpu.memory_space<vmem>>, vector<1x1x128xf32>
    %113 = vector.shape_cast %112 : vector<1x1x128xf32> to vector<1x128xf32>
    %114 = vector.broadcast %113 : vector<1x128xf32> to vector<8x128xf32>
    %115 = arith.mulf %111, %114 : vector<8x128xf32>
    %116 = arith.addf %109, %115 : vector<8x128xf32>
    %117 = vector.extract_strided_slice %60 {offsets = [64, 0], sizes = [8, 128], strides = [1, 1]} : vector<72x128xf32> to vector<8x128xf32>
    %c119_i32 = arith.constant 119 : i32
    %118 = tpu.dynamic_rotate %117 by %c119_i32 dim 1 : vector<8x128xf32>, i32 -> vector<8x128xf32>
    %c8 = arith.constant 8 : index
    %c0_67 = arith.constant 0 : index
    %c0_68 = arith.constant 0 : index
    %119 = vector.load %arg17[%c8, %c0_67, %c0_68] : memref<9x1x128xf32, #tpu.memory_space<vmem>>, vector<1x1x128xf32>
    %120 = vector.shape_cast %119 : vector<1x1x128xf32> to vector<1x128xf32>
    %121 = vector.broadcast %120 : vector<1x128xf32> to vector<8x128xf32>
    %122 = arith.mulf %118, %121 : vector<8x128xf32>
    %123 = arith.addf %116, %122 : vector<8x128xf32>
    %c0_69 = arith.constant 0 : index
    %c0_70 = arith.constant 0 : index
    %124 = vector.load %arg16[%c0_69, %c0_70] : memref<8x1xf32, #tpu.memory_space<vmem>>, vector<8x1xf32>
    %125 = vector.broadcast %124 : vector<8x1xf32> to vector<8x128xf32>
    %126 = arith.addf %123, %125 : vector<8x128xf32>
    %cst_71 = arith.constant 0.000000e+00 : f32
    %127 = vector.broadcast %cst_71 : f32 to vector<8x128xf32>
    %128 = arith.maximumf %126, %127 : vector<8x128xf32>
    %c0_72 = arith.constant 0 : index
    %c0_73 = arith.constant 0 : index
    %129 = vector.load %arg18[%c0_72, %c0_73] : memref<8x128xf32, #tpu.memory_space<vmem>>, vector<8x128xf32>
    tpu.vector_store %arg18[%c0_72, %c0_73], %128 {strides = array<i32>} : memref<8x128xf32, #tpu.memory_space<vmem>>, vector<8x128xf32>,
    return
  }
}

</mosaic_0001>

<bundles_post_ra>
// kernel: hfs_forward.1
= control target key start
LH: loop header
LB: loop body
LE: loop exit
PB: predicated region body
PF: predicated region fallthrough
CT: control target
= control target key end

     0   :  { %v1155_v20 = vmov 0   ;;  %vm593_vm0 = vcmask 1041408   ;;  %vm580_vm1 = vcmask 15360   ;;  %vm635_vm2 = vcmask 261120   ;;  %s1157_s26 = smov 9   ;;  %s1159_s27 = smov 7   ;;  %s2136_s0 = inlined_call_operand.vmem [shape: f32[1280,2], index: 0, kind: input, shape index: {}]   ;;  %s2137_s3 = inlined_call_operand.vmem [shape: f32[32,1], index: 3, kind: input, shape index: {}]   ;;  %s2138_s2 = inlined_call_operand.vmem [shape: f32[32,1280], index: 2, kind: input, shape index: {}]   ;;  %s2139_s14 = inlined_call_operand.<no memory space> [shape: f32[1,1], index: 14, kind: input, shape index: {}]   ;;  %s2140_s4 = inlined_call_operand.vmem [shape: f32[2,128], index: 4, kind: input, shape index: {}]   ;;  %s2141_s7 = inlined_call_operand.vmem [shape: f32[128,2], index: 7, kind: input, shape index: {}]   ;;  %s2142_s5 = inlined_call_operand.vmem [shape: f32[32,128], index: 5, kind: input, shape index: {}]   ;;  %s2143_s6 = inlined_call_operand.vmem [shape: f32[8,32], index: 6, kind: input, shape index: {}]   ;;  %s2144_s9 = inlined_call_operand.vmem [shape: f32[8,1], index: 9, kind: input, shape index: {}]   ;;  %s2145_s11 = inlined_call_operand.vmem [shape: f32[8,1], index: 11, kind: input, shape index: {}]   ;;  %s2146_s8 = inlined_call_operand.vmem [shape: f32[8,8], index: 8, kind: input, shape index: {}]   ;;  %s2147_s10 = inlined_call_operand.vmem [shape: f32[8,8], index: 10, kind: input, shape index: {}]   ;;  %s2148_s12 = inlined_call_operand.vmem [shape: f32[128,128], index: 12, kind: input, shape index: {}]   ;;  %s2149_s13 = inlined_call_operand.vmem [shape: f32[128,128], index: 13, kind: input, shape index: {}]   ;;  %s2150_s1 = inlined_call_operand.vmem [shape: f32[8,128], index: 1, kind: input, shape index: {}]   ;;  %s2151_s15 = inlined_call_operand.vmem [shape: f32[72,16], index: 15, kind: input, shape index: {}]   ;;  %s2152_s17 = inlined_call_operand.vmem [shape: f32[9,1,128], index: 17, kind: input, shape index: {}]   ;;  %s2153_s16 = inlined_call_operand.vmem [shape: f32[8,1], index: 16, kind: input, shape index: {}]   ;;  %s2154_s18 = inlined_call_operand.vmem [shape: f32[8,128], index: 18, kind: output, shape index: {}]  }
   0x1   :  { %2158 = sst [smem:[#allocation3_spill]] %s2136_s0  ;;  %1133 = vset.pattern.permute.xlu0 %v1155_v20  ;;  %1134 = vset.pattern.permute.xlu1 %v1155_v20  ;;  %vm702_vm3 = vcmask 64512   ;;  %vm931_vm13 = vcmask 130048   ;;  %s1160_s28 = smov 1  }
   0x2   :  { %2159 = sst [smem:[#allocation4_spill]] %s2137_s3  ;;  %1135 = vset.pattern.permute.xlu2 %v1155_v20  ;;  %s1161_s30 = smov 127  }
   0x3   :  { %2160 = sst [smem:[#allocation5_spill]] %s2138_s2 }
   0x4   :  { %s2161_s29 = sld [smem:[#allocation3_spill]] }
   0x5   :  { %s2162_s25 = sld [smem:[#allocation4_spill]] }
   0x6   :  { %s2163_s21 = sld [smem:[#allocation5_spill]] }
   0xa   :  { %v116_v0 = vld [vmem:[%s2161_s29 + $0x78] sm:$0xff]  ;;  %v115_v2 = vld [vmem:[%s2161_s29 + $0x70] sm:$0xff]  ;;  %v114_v5 = vld [vmem:[%s2161_s29 + $0x68] sm:$0xff] }
   0xb   :  { %v148_v1 = vld [vmem:[%s2161_s29 + $0x178] sm:$0xff]  ;;  %285 = vmatpush.msra.mxu0 %v116_v0  ;;  %v147_v4 = vld [vmem:[%s2161_s29 + $0x170] sm:$0xff]  ;;  %v146_v7 = vld [vmem:[%s2161_s29 + $0x168] sm:$0xff] }
   0xc   :  { %343 = vmatpush.msra.mxu2 %v148_v1  ;;  %v132_v3 = vld [vmem:[%s2161_s29 + $0xf8] sm:$0xff]  ;;  %v131_v6 = vld [vmem:[%s2161_s29 + $0xf0] sm:$0xff]  ;;  %v130_v8 = vld [vmem:[%s2161_s29 + $0xe8] sm:$0xff] }
   0xd   :  { %314 = vmatpush.msra.mxu1 %v132_v3  ;;  %286 = vmatpush.msra.mxu0 %v115_v2  ;;  %v113_v9 = vld [vmem:[%s2161_s29 + $0x60] sm:$0xff]  ;;  %v112_v12 = vld [vmem:[%s2161_s29 + $0x58] sm:$0xff]  ;;  %v111_v15 = vld [vmem:[%s2161_s29 + $0x50] sm:$0xff] }
   0xe   :  { %344 = vmatpush.msra.mxu2 %v147_v4  ;;  %v145_v10 = vld [vmem:[%s2161_s29 + $0x160] sm:$0xff]  ;;  %v144_v13 = vld [vmem:[%s2161_s29 + $0x158] sm:$0xff]  ;;  %v143_v16 = vld [vmem:[%s2161_s29 + $0x150] sm:$0xff] }
   0xf   :  { %315 = vmatpush.msra.mxu1 %v131_v6  ;;  %287 = vmatpush.msra.mxu0 %v114_v5  ;;  %v129_v11 = vld [vmem:[%s2161_s29 + $0xe0] sm:$0xff]  ;;  %v128_v14 = vld [vmem:[%s2161_s29 + $0xd8] sm:$0xff]  ;;  %v127_v17 = vld [vmem:[%s2161_s29 + $0xd0] sm:$0xff] }
  0x10   :  { %345 = vmatpush.msra.mxu2 %v146_v7  ;;  %v110_v18 = vld [vmem:[%s2161_s29 + $0x48] sm:$0xff]  ;;  %v109_v22 = vld [vmem:[%s2161_s29 + $0x40] sm:$0xff]  ;;  %v108_v25 = vld [vmem:[%s2161_s29 + $0x38] sm:$0xff] }
  0x11   :  { %316 = vmatpush.msra.mxu1 %v130_v8  ;;  %288 = vmatpush.msra.mxu0 %v113_v9  ;;  %v142_v19 = vld [vmem:[%s2161_s29 + $0x148] sm:$0xff]  ;;  %v141_v23 = vld [vmem:[%s2161_s29 + $0x140] sm:$0xff]  ;;  %v140_v26 = vld [vmem:[%s2161_s29 + $0x138] sm:$0xff] }
  0x12   :  { %346 = vmatpush.msra.mxu2 %v145_v10  ;;  %v126_v21 = vld [vmem:[%s2161_s29 + $0xc8] sm:$0xff]  ;;  %v125_v24 = vld [vmem:[%s2161_s29 + $0xc0] sm:$0xff]  ;;  %v124_v27 = vld [vmem:[%s2161_s29 + $0xb8] sm:$0xff] }
  0x13   :  { %317 = vmatpush.msra.mxu1 %v129_v11  ;;  %289 = vmatpush.msra.mxu0 %v112_v12  ;;  %v107_v28 = vld [vmem:[%s2161_s29 + $0x30] sm:$0xff]  ;;  %v106_v31 = vld [vmem:[%s2161_s29 + $0x28] sm:$0xff]  ;;  %v261_v34 = vld [vmem:[%s2162_s25] sm:$0xff] }
  0x14   :  { %347 = vmatpush.msra.mxu2 %v144_v13  ;;  %v139_v29 = vld [vmem:[%s2161_s29 + $0x130] sm:$0xff]  ;;  %v138_v32 = vld [vmem:[%s2161_s29 + $0x128] sm:$0xff]  ;;  %v105_v35 = vld [vmem:[%s2161_s29 + $0x20] sm:$0xff]  ;;  %267 = vperm.xlu0 %1133, %v261_v34  }
  0x15   :  { %318 = vmatpush.msra.mxu1 %v128_v14  ;;  %290 = vmatpush.msra.mxu0 %v111_v15  ;;  %v123_v30 = vld [vmem:[%s2161_s29 + $0xb0] sm:$0xff]  ;;  %v122_v33 = vld [vmem:[%s2161_s29 + $0xa8] sm:$0xff]  ;;  %v137_v36 = vld [vmem:[%s2161_s29 + $0x120] sm:$0xff] }
  0x16   :  { %348 = vmatpush.msra.mxu2 %v143_v16  ;;  %v121_v37 = vld [vmem:[%s2161_s29 + $0xa0] sm:$0xff]  ;;  %v104_v38 = vld [vmem:[%s2161_s29 + $0x18] sm:$0xff]  ;;  %v103_v41 = vld [vmem:[%s2161_s29 + $0x10] sm:$0xff] }
  0x17   :  { %319 = vmatpush.msra.mxu1 %v127_v17  ;;  %291 = vmatpush.msra.mxu0 %v110_v18  ;;  %v136_v39 = vld [vmem:[%s2161_s29 + $0x118] sm:$0xff]  ;;  %v135_v42 = vld [vmem:[%s2161_s29 + $0x110] sm:$0xff]  ;;  %v262_v44 = vld [vmem:[%s2162_s25 + $0x8] sm:$0xff] }
  0x18   :  { %349 = vmatpush.msra.mxu2 %v142_v19  ;;  %v120_v40 = vld [vmem:[%s2161_s29 + $0x98] sm:$0xff]  ;;  %v119_v43 = vld [vmem:[%s2161_s29 + $0x90] sm:$0xff]  ;;  %v102_v45 = vld [vmem:[%s2161_s29 + $0x8] sm:$0xff] }
  0x19   :  { %320 = vmatpush.msra.mxu1 %v126_v21  ;;  %292 = vmatpush.msra.mxu0 %v109_v22  ;;  %v134_v46 = vld [vmem:[%s2161_s29 + $0x108] sm:$0xff]  ;;  %v263_v48 = vld [vmem:[%s2162_s25 + $0x10] sm:$0xff]  ;;  %v101_v49 = vld [vmem:[%s2161_s29] sm:$0xff] }
  0x1a   :  { %350 = vmatpush.msra.mxu2 %v141_v23  ;;  %v118_v47 = vld [vmem:[%s2161_s29 + $0x88] sm:$0xff]  ;;  %v133_v50 = vld [vmem:[%s2161_s29 + $0x100] sm:$0xff]  ;;  %v63_v52 = vld [vmem:[%s2163_s21 + $0x10] sm:$0xff]  ;;  %277 = vperm.xlu1 %1134, %v263_v48  }
  0x1b   :  { %321 = vmatpush.msra.mxu1 %v125_v24  ;;  %293 = vmatpush.msra.mxu0 %v108_v25  ;;  %v61_v51 = vld [vmem:[%s2163_s21] sm:$0xff]  ;;  %v164_v54 = vld [vmem:[%s2161_s29 + $0x1f8] sm:$0xff]  ;;  %v62_v55 = vld [vmem:[%s2163_s21 + $0x8] sm:$0xff] }
  0x1c   :  { %351 = vmatpush.msra.mxu2 %v140_v26  ;;  %272 = vperm.xlu0 %1133, %v262_v44   ;;  %v117_v53 = vld [vmem:[%s2161_s29 + $0x80] sm:$0xff]  ;;  %v212_v56 = vld [vmem:[%s2161_s29 + $0x378] sm:$0xff]  ;;  %v163_v57 = vld [vmem:[%s2161_s29 + $0x1f0] sm:$0xff] }
  0x1d   :  { %322 = vmatpush.msra.mxu1 %v124_v27  ;;  %294 = vmatpush.msra.mxu0 %v107_v28  ;;  %v228_v58 = vld [vmem:[%s2161_s29 + $0x3f8] sm:$0xff]  ;;  %v211_v59 = vld [vmem:[%s2161_s29 + $0x370] sm:$0xff]  ;;  %v162_v60 = vld [vmem:[%s2161_s29 + $0x1e8] sm:$0xff] }
  0x1e   :  { %352 = vmatpush.msra.mxu2 %v139_v29  ;;  %v196_v61 = vld [vmem:[%s2161_s29 + $0x2f8] sm:$0xff]  ;;  %v227_v62 = vld [vmem:[%s2161_s29 + $0x3f0] sm:$0xff]  ;;  %488 = vmatpush.msra.mxu3 %v228_v58  ;;  %v210_v0 = vld [vmem:[%s2161_s29 + $0x368] sm:$0xff] }
  0x1f   :  { %323 = vmatpush.msra.mxu1 %v123_v30  ;;  %295 = vmatpush.msra.mxu0 %v106_v31  ;;  %v264_v63 = vld [vmem:[%s2162_s25 + $0x18] sm:$0xff]  ;;  %v161_v1 = vld [vmem:[%s2161_s29 + $0x1e0] sm:$0xff]  ;;  %v195_v2 = vld [vmem:[%s2161_s29 + $0x2f0] sm:$0xff] }
  0x20   :  { %353 = vmatpush.msra.mxu2 %v138_v32  ;;  %v71_v3 = vld [vmem:[%s2163_s21 + $0x50] sm:$0xff]  ;;  %v73_v4 = vld [vmem:[%s2163_s21 + $0x60] sm:$0xff]  ;;  %489 = vmatpush.msra.mxu3 %v227_v62  ;;  %v160_v5 = vld [vmem:[%s2161_s29 + $0x1d8] sm:$0xff] }
  0x21   :  { %324 = vmatpush.msra.mxu1 %v122_v33  ;;  %296 = vmatpush.msra.mxu0 %v105_v35  ;;  %v209_v6 = vld [vmem:[%s2161_s29 + $0x360] sm:$0xff]  ;;  %v72_v7 = vld [vmem:[%s2163_s21 + $0x58] sm:$0xff]  ;;  %v226_v8 = vld [vmem:[%s2161_s29 + $0x3e8] sm:$0xff] }
  0x22   :  { %354 = vmatpush.msra.mxu2 %v137_v36  ;;  %282 = vperm.xlu1 %1134, %v264_v63   ;;  %v159_v9 = vld [vmem:[%s2161_s29 + $0x1d0] sm:$0xff]  ;;  %v194_v10 = vld [vmem:[%s2161_s29 + $0x2e8] sm:$0xff]  ;;  %v208_v11 = vld [vmem:[%s2161_s29 + $0x358] sm:$0xff] }
  0x23   :  { %325 = vmatpush.msra.mxu1 %v121_v37  ;;  %297 = vmatpush.msra.mxu0 %v104_v38  ;;  %v225_v12 = vld [vmem:[%s2161_s29 + $0x3e0] sm:$0xff]  ;;  %v158_v13 = vld [vmem:[%s2161_s29 + $0x1c8] sm:$0xff]  ;;  %v207_v15 = vld [vmem:[%s2161_s29 + $0x350] sm:$0xff] }
  0x24   :  { %355 = vmatpush.msra.mxu2 %v136_v39  ;;  %490 = vmatpush.msra.mxu3 %v226_v8  ;;  %v193_v14 = vld [vmem:[%s2161_s29 + $0x2e0] sm:$0xff]  ;;  %v224_v16 = vld [vmem:[%s2161_s29 + $0x3d8] sm:$0xff]  ;;  %v83_v20 = vld [vmem:[%s2163_s21 + $0xb0] sm:$0xff] }
  0x25   :  { %326 = vmatpush.msra.mxu1 %v120_v40  ;;  %298 = vmatpush.msra.mxu0 %v103_v41  ;;  %v157_v17 = vld [vmem:[%s2161_s29 + $0x1c0] sm:$0xff]  ;;  %v192_v18 = vld [vmem:[%s2161_s29 + $0x2d8] sm:$0xff]  ;;  %v206_v22 = vld [vmem:[%s2161_s29 + $0x348] sm:$0xff] }
  0x26   :  { %356 = vmatpush.msra.mxu2 %v135_v42  ;;  %491 = vmatpush.msra.mxu3 %v225_v12  ;;  %v81_v19 = vld [vmem:[%s2163_s21 + $0xa0] sm:$0xff]  ;;  %v156_v21 = vld [vmem:[%s2161_s29 + $0x1b8] sm:$0xff]  ;;  %v82_v23 = vld [vmem:[%s2163_s21 + $0xa8] sm:$0xff] }
  0x27   :  { %327 = vmatpush.msra.mxu1 %v119_v43  ;;  %299 = vmatpush.msra.mxu0 %v102_v45  ;;  %v223_v24 = vld [vmem:[%s2161_s29 + $0x3d0] sm:$0xff]  ;;  %v205_v27 = vld [vmem:[%s2161_s29 + $0x340] sm:$0xff]  ;;  %v222_v28 = vld [vmem:[%s2161_s29 + $0x3c8] sm:$0xff] }
  0x28   :  { %357 = vmatpush.msra.mxu2 %v134_v46  ;;  %492 = vmatpush.msra.mxu3 %v224_v16  ;;  %v155_v25 = vld [vmem:[%s2161_s29 + $0x1b0] sm:$0xff]  ;;  %v154_v29 = vld [vmem:[%s2161_s29 + $0x1a8] sm:$0xff]  ;;  %v204_v31 = vld [vmem:[%s2161_s29 + $0x338] sm:$0xff] }
  0x29   :  { %328 = vmatpush.msra.mxu1 %v118_v47  ;;  %300 = vmatpush.msra.mxu0 %v101_v49  ;;  %v191_v26 = vld [vmem:[%s2161_s29 + $0x2d0] sm:$0xff]  ;;  %v190_v30 = vld [vmem:[%s2161_s29 + $0x2c8] sm:$0xff]  ;;  %v221_v32 = vld [vmem:[%s2161_s29 + $0x3c0] sm:$0xff] }
  0x2a   :  { %358 = vmatpush.msra.mxu2 %v133_v50  ;;  %301 = vmatmul.f32.vlgmr.msra.gmra.mxu0 %v61_v51  ;;  %v153_v33 = vld [vmem:[%s2161_s29 + $0x1a0] sm:$0xff]  ;;  %v91_v35 = vld [vmem:[%s2163_s21 + $0xf0] sm:$0xff]  ;;  %v152_v37 = vld [vmem:[%s2161_s29 + $0x198] sm:$0xff] }
  0x2b   :  { %359 = vmatmul.f32.vlgmr.msra.gmra.mxu2 %v63_v52  ;;  %329 = vmatpush.msra.mxu1 %v117_v53  ;;  %v189_v34 = vld [vmem:[%s2161_s29 + $0x2c0] sm:$0xff]  ;;  %v203_v38 = vld [vmem:[%s2161_s29 + $0x330] sm:$0xff]  ;;  %v92_v39 = vld [vmem:[%s2163_s21 + $0xf8] sm:$0xff] }
  0x2c   :  { %372 = vmatpush.msrb.mxu0 %v164_v54  ;;  %330 = vmatmul.f32.vlgmr.msra.gmra.mxu1 %v62_v55  ;;  %v93_v36 = vld [vmem:[%s2163_s21 + $0x100] sm:$0xff]  ;;  %v220_v40 = vld [vmem:[%s2161_s29 + $0x3b8] sm:$0xff]  ;;  %v151_v41 = vld [vmem:[%s2161_s29 + $0x190] sm:$0xff] }
  0x2d   :  { %459 = vmatpush.msrb.mxu2 %v212_v56  ;;  %430 = vmatpush.msrb.mxu1 %v196_v61  ;;  %v188_v42 = vld [vmem:[%s2161_s29 + $0x2b8] sm:$0xff]  ;;  %v202_v43 = vld [vmem:[%s2161_s29 + $0x328] sm:$0xff]  ;;  %v219_v44 = vld [vmem:[%s2161_s29 + $0x3b0] sm:$0xff] }
  0x2e   :  { %373 = vmatpush.msrb.mxu0 %v163_v57  ;;  %493 = vmatpush.msra.mxu3 %v223_v24  ;;  %v150_v45 = vld [vmem:[%s2161_s29 + $0x188] sm:$0xff]  ;;  %v187_v46 = vld [vmem:[%s2161_s29 + $0x2b0] sm:$0xff]  ;;  %v201_v47 = vld [vmem:[%s2161_s29 + $0x320] sm:$0xff] }
  0x2f   :  { %460 = vmatpush.msrb.mxu2 %v211_v59  ;;  %431 = vmatpush.msrb.mxu1 %v195_v2  ;;  %v218_v48 = vld [vmem:[%s2161_s29 + $0x3a8] sm:$0xff]  ;;  %v149_v49 = vld [vmem:[%s2161_s29 + $0x180] sm:$0xff]  ;;  %v64_v51 = vld [vmem:[%s2163_s21 + $0x18] sm:$0xff] }
  0x30   :  { %374 = vmatpush.msrb.mxu0 %v162_v60  ;;  %494 = vmatpush.msra.mxu3 %v222_v28  ;;  %v186_v50 = vld [vmem:[%s2161_s29 + $0x2a8] sm:$0xff]  ;;  %v200_v52 = vld [vmem:[%s2161_s29 + $0x318] sm:$0xff]  ;;  %v217_v54 = vld [vmem:[%s2161_s29 + $0x3a0] sm:$0xff] }
  0x31   :  { %461 = vmatpush.msrb.mxu2 %v210_v0  ;;  %432 = vmatpush.msrb.mxu1 %v194_v10  ;;  %v180_v53 = vld [vmem:[%s2161_s29 + $0x278] sm:$0xff]  ;;  %v185_v55 = vld [vmem:[%s2161_s29 + $0x2a0] sm:$0xff]  ;;  %v199_v56 = vld [vmem:[%s2161_s29 + $0x310] sm:$0xff] }
  0x32   :  { %375 = vmatpush.msrb.mxu0 %v161_v1  ;;  %495 = vmatpush.msra.mxu3 %v221_v32  ;;  %v179_v57 = vld [vmem:[%s2161_s29 + $0x270] sm:$0xff]  ;;  %v216_v58 = vld [vmem:[%s2161_s29 + $0x398] sm:$0xff]  ;;  %v198_v60 = vld [vmem:[%s2161_s29 + $0x308] sm:$0xff] }
  0x33   :  { %304 = vmatmul.f32.gmra.mxu0 %v71_v3  ;;  %362 = vmatmul.f32.gmra.mxu2 %v73_v4  ;;  %v184_v59 = vld [vmem:[%s2161_s29 + $0x298] sm:$0xff]  ;;  %v178_v61 = vld [vmem:[%s2161_s29 + $0x268] sm:$0xff]  ;;  %v215_v62 = vld [vmem:[%s2161_s29 + $0x390] sm:$0xff] }
  0x34   :  { %376 = vmatpush.msrb.mxu0 %v160_v5  ;;  %462 = vmatpush.msrb.mxu2 %v209_v6  ;;  %v183_v63 = vld [vmem:[%s2161_s29 + $0x290] sm:$0xff]  ;;  %v197_v0 = vld [vmem:[%s2161_s29 + $0x300] sm:$0xff]  ;;  %v214_v2 = vld [vmem:[%s2161_s29 + $0x388] sm:$0xff] }
  0x35   :  { %333 = vmatmul.f32.gmra.mxu1 %v72_v7  ;;  %496 = vmatpush.msra.mxu3 %v220_v40  ;;  %v177_v1 = vld [vmem:[%s2161_s29 + $0x260] sm:$0xff]  ;;  %v74_v3 = vld [vmem:[%s2163_s21 + $0x68] sm:$0xff]  ;;  %v67_v4 = vld [vmem:[%s2163_s21 + $0x30] sm:$0xff] }
  0x36   :  { %377 = vmatpush.msrb.mxu0 %v159_v9  ;;  %463 = vmatpush.msrb.mxu2 %v208_v11  ;;  %v176_v5 = vld [vmem:[%s2161_s29 + $0x258] sm:$0xff]  ;;  %v182_v6 = vld [vmem:[%s2161_s29 + $0x288] sm:$0xff]  ;;  %v213_v7 = vld [vmem:[%s2161_s29 + $0x380] sm:$0xff] }
  0x37   :  { %433 = vmatpush.msrb.mxu1 %v193_v14  ;;  %497 = vmatpush.msra.mxu3 %v219_v44  ;;  %v175_v8 = vld [vmem:[%s2161_s29 + $0x250] sm:$0xff]  ;;  %v68_v9 = vld [vmem:[%s2163_s21 + $0x38] sm:$0xff]  ;;  %v181_v10 = vld [vmem:[%s2161_s29 + $0x280] sm:$0xff] }
  0x38   :  { %378 = vmatpush.msrb.mxu0 %v158_v13  ;;  %464 = vmatpush.msrb.mxu2 %v207_v15  ;;  %v174_v11 = vld [vmem:[%s2161_s29 + $0x248] sm:$0xff]  ;;  %v260_v13 = vld [vmem:[%s2161_s29 + $0x4f8] sm:$0xff]  ;;  %v173_v14 = vld [vmem:[%s2161_s29 + $0x240] sm:$0xff] }
  0x39   :  { %434 = vmatpush.msrb.mxu1 %v192_v18  ;;  %498 = vmatpush.msra.mxu3 %v218_v48  ;;  %v66_v12 = vld [vmem:[%s2163_s21 + $0x28] sm:$0xff]  ;;  %v84_v15 = vld [vmem:[%s2163_s21 + $0xb8] sm:$0xff]  ;;  %v259_v16 = vld [vmem:[%s2161_s29 + $0x4f0] sm:$0xff] }
  0x3a   :  { %379 = vmatpush.msrb.mxu0 %v157_v17  ;;  %465 = vmatpush.msrb.mxu2 %v206_v22  ;;  %v172_v17 = vld [vmem:[%s2161_s29 + $0x238] sm:$0xff]  ;;  %v77_v18 = vld [vmem:[%s2163_s21 + $0x80] sm:$0xff]  ;;  %v94_v28 = vld [vmem:[%s2163_s21 + $0x108] sm:$0xff] }
  0x3b   :  { %307 = vmatmul.f32.gmra.mxu0 %v81_v19  ;;  %365 = vmatmul.f32.gmra.mxu2 %v83_v20  ;;  %v258_v19 = vld [vmem:[%s2161_s29 + $0x4e8] sm:$0xff]  ;;  %v171_v20 = vld [vmem:[%s2161_s29 + $0x230] sm:$0xff]  ;;  %v257_v22 = vld [vmem:[%s2161_s29 + $0x4e0] sm:$0xff] }
  0x3c   :  { %380 = vmatpush.msrb.mxu0 %v156_v21  ;;  %435 = vmatpush.msrb.mxu1 %v191_v26  ;;  %v78_v21 = vld [vmem:[%s2163_s21 + $0x88] sm:$0xff]  ;;  %v76_v24 = vld [vmem:[%s2163_s21 + $0x78] sm:$0xff]  ;;  %v165_v40 = vld [vmem:[%s2161_s29 + $0x200] sm:$0xff] }
  0x3d   :  { %336 = vmatmul.f32.gmra.mxu1 %v82_v23  ;;  %466 = vmatpush.msrb.mxu2 %v205_v27  ;;  %v170_v23 = vld [vmem:[%s2161_s29 + $0x228] sm:$0xff]  ;;  %v256_v26 = vld [vmem:[%s2161_s29 + $0x4d8] sm:$0xff]  ;;  %v169_v27 = vld [vmem:[%s2161_s29 + $0x220] sm:$0xff] }
  0x3e   :  { %381 = vmatpush.msrb.mxu0 %v155_v25  ;;  %436 = vmatpush.msrb.mxu1 %v190_v30  ;;  %v23_v25 = vstv %s2139_s14  ;;  %v168_v30 = vld [vmem:[%s2161_s29 + $0x218] sm:$0xff]  ;;  %v254_v32 = vld [vmem:[%s2161_s29 + $0x4c8] sm:$0xff]  ;;  %v97_v44 = vld [vmem:[%s2163_s21 + $0x120] sm:$0xff]  ;;  %s1158_s14 = smov 8  }
  0x3f   :  { %467 = vmatpush.msrb.mxu2 %v204_v31  ;;  %499 = vmatpush.msra.mxu3 %v217_v54  ;;  %24 = vst [vmem:[#allocation2] sm:$0x1] %v23_v25  ;;  %v87_v31 = vld [vmem:[%s2163_s21 + $0xd0] sm:$0xff]  ;;  %v249_v48 = vld [vmem:[%s2161_s29 + $0x4a0] sm:$0xff] }
  0x40   :  { %382 = vmatpush.msrb.mxu0 %v154_v29  ;;  %437 = vmatpush.msrb.mxu1 %v189_v34  ;;  %v255_v29 = vld [vmem:[%s2161_s29 + $0x4d0] sm:$0xff]  ;;  %v88_v34 = vld [vmem:[%s2163_s21 + $0xd8] sm:$0xff] }
  0x41   :  { %468 = vmatpush.msrb.mxu2 %v203_v38  ;;  %500 = vmatpush.msra.mxu3 %v216_v58  ;;  %v247_v54 = vld [vmem:[%s2161_s29 + $0x490] sm:$0xff]  ;;  %v245_v58 = vld [vmem:[%s2161_s29 + $0x480] sm:$0xff] }
  0x42   :  { %383 = vmatpush.msrb.mxu0 %v153_v33  ;;  %438 = vmatpush.msrb.mxu1 %v188_v42  ;;  %v167_v33 = vld [vmem:[%s2161_s29 + $0x210] sm:$0xff] }
  0x43   :  { %310 = vmatmul.f32.gmra.mxu0 %v91_v35  ;;  %368 = vmatmul.f32.gmra.mxu2 %v93_v36  ;;  %v253_v35 = vld [vmem:[%s2161_s29 + $0x4c0] sm:$0xff]  ;;  %v166_v36 = vld [vmem:[%s2161_s29 + $0x208] sm:$0xff]  ;;  %v251_v42 = vld [vmem:[%s2161_s29 + $0x4b0] sm:$0xff] }
  0x44   :  { %384 = vmatpush.msrb.mxu0 %v152_v37  ;;  %469 = vmatpush.msrb.mxu2 %v202_v43  ;;  %v86_v37 = vld [vmem:[%s2163_s21 + $0xc8] sm:$0xff]  ;;  %v244_v43 = vld [vmem:[%s2161_s29 + $0x478] sm:$0xff] }
  0x45   :  { %339 = vmatmul.f32.gmra.mxu1 %v92_v39  ;;  %501 = vmatpush.msra.mxu3 %v215_v62  ;;  %v252_v39 = vld [vmem:[%s2161_s29 + $0x4b8] sm:$0xff]  ;;  %v85_v62 = vld [vmem:[%s2163_s21 + $0xc0] sm:$0xff] }
  0x46   :  { %385 = vmatpush.msrb.mxu0 %v151_v41  ;;  %439 = vmatpush.msrb.mxu1 %v187_v46  ;;  %v892_v38 = vld [vmem:[#allocation2] sm:$0x1]  ;;  %v243_v46 = vld [vmem:[%s2161_s29 + $0x470] sm:$0xff] }
  0x47   :  { %470 = vmatpush.msrb.mxu2 %v201_v47  ;;  %502 = vmatpush.msra.mxu3 %v214_v2  ;;  %v65_v41 = vld [vmem:[%s2163_s21 + $0x20] sm:$0xff]  ;;  %v98_v47 = vld [vmem:[%s2163_s21 + $0x128] sm:$0xff]  ;;  %v80_v2 = vld [vmem:[%s2163_s21 + $0x98] sm:$0xff] }
  0x48   :  { %386 = vmatpush.msrb.mxu0 %v150_v45  ;;  %440 = vmatpush.msrb.mxu1 %v186_v50  ;;  %v250_v45 = vld [vmem:[%s2161_s29 + $0x4a8] sm:$0xff]  ;;  %v96_v50 = vld [vmem:[%s2163_s21 + $0x118] sm:$0xff] }
  0x49   :  { %471 = vmatpush.msrb.mxu2 %v200_v52  ;;  %503 = vmatpush.msra.mxu3 %v213_v7  ;;  %v241_v52 = vld [vmem:[%s2161_s29 + $0x460] sm:$0xff]  ;;  %v230_v7 = vld [vmem:[%s2161_s29 + $0x408] sm:$0xff] }
  0x4a   :  { %387 = vmatpush.msrb.mxu0 %v149_v49  ;;  %441 = vmatpush.msrb.mxu1 %v185_v55  ;;  %v242_v49 = vld [vmem:[%s2161_s29 + $0x468] sm:$0xff]  ;;  %v240_v55 = vld [vmem:[%s2161_s29 + $0x458] sm:$0xff] }
  0x4b   :  { %388 = vmatmul.f32.vlgmr.msrb.gmra.mxu0 %v64_v51  ;;  %472 = vmatpush.msrb.mxu2 %v199_v56  ;;  %v248_v51 = vld [vmem:[%s2161_s29 + $0x498] sm:$0xff]  ;;  %v246_v56 = vld [vmem:[%s2161_s29 + $0x488] sm:$0xff] }
  0x4c   :  { %401 = vmatpush.msra.mxu0 %v180_v53  ;;  %442 = vmatpush.msrb.mxu1 %v184_v59  ;;  %v75_v53 = vld [vmem:[%s2163_s21 + $0x70] sm:$0xff]  ;;  %v238_v59 = vld [vmem:[%s2161_s29 + $0x448] sm:$0xff] }
  0x4d   :  { %473 = vmatpush.msrb.mxu2 %v198_v60  ;;  %504 = vmatmul.f32.vlgmr.msra.gmra.mxu3 %v68_v9  ;;  %v70_v60 = vld [vmem:[%s2163_s21 + $0x48] sm:$0xff]  ;;  %v229_v9 = vld [vmem:[%s2161_s29 + $0x400] sm:$0xff] }
  0x4e   :  { %402 = vmatpush.msra.mxu0 %v179_v57  ;;  %443 = vmatpush.msrb.mxu1 %v183_v63  ;;  %v239_v57 = vld [vmem:[%s2161_s29 + $0x450] sm:$0xff]  ;;  %v236_v63 = vld [vmem:[%s2161_s29 + $0x438] sm:$0xff] }
  0x4f   :  { %474 = vmatpush.msrb.mxu2 %v197_v0  ;;  %895 = vperm.xlu0 %1133, %v892_v38   ;;  %v235_v0 = vld [vmem:[%s2161_s29 + $0x430] sm:$0xff] }
  0x50   :  { %403 = vmatpush.msra.mxu0 %v178_v61  ;;  %475 = vmatmul.f32.vlgmr.msrb.gmra.mxu2 %v67_v4  ;;  %v237_v61 = vld [vmem:[%s2161_s29 + $0x440] sm:$0xff]  ;;  %v95_v4 = vld [vmem:[%s2163_s21 + $0x110] sm:$0xff] }
  0x51   :  { %444 = vmatpush.msrb.mxu1 %v182_v6  ;;  %v231_v6 = vld [vmem:[%s2161_s29 + $0x410] sm:$0xff] }
  0x52   :  { %404 = vmatpush.msra.mxu0 %v177_v1  ;;  %v234_v1 = vld [vmem:[%s2161_s29 + $0x428] sm:$0xff] }
  0x53   :  { %391 = vmatmul.f32.gmra.mxu0 %v74_v3  ;;  %445 = vmatpush.msrb.mxu1 %v181_v10  ;;  %v233_v3 = vld [vmem:[%s2161_s29 + $0x420] sm:$0xff] }
  0x54   :  { %405 = vmatpush.msra.mxu0 %v176_v5  ;;  %446 = vmatmul.f32.vlgmr.msrb.gmra.mxu1 %v66_v12  ;;  %v232_v5 = vld [vmem:[%s2161_s29 + $0x418] sm:$0xff]  ;;  %v69_v10 = vld [vmem:[%s2163_s21 + $0x40] sm:$0xff]  ;;  %v79_v12 = vld [vmem:[%s2163_s21 + $0x90] sm:$0xff] }
  0x55   :  { %546 = vmatpush.msra.mxu1 %v260_v13  ;;  %507 = vmatmul.f32.gmra.mxu3 %v78_v21  ;;  %v89_v13 = vld [vmem:[%s2163_s21 + $0xe0] sm:$0xff] }
  0x56   :  { %406 = vmatpush.msra.mxu0 %v175_v8  ;;  %v90_v8 = vld [vmem:[%s2163_s21 + $0xe8] sm:$0xff] }
  0x57   :  { %547 = vmatpush.msra.mxu1 %v259_v16 }
  0x58   :  { %407 = vmatpush.msra.mxu0 %v174_v11  ;;  %478 = vmatmul.f32.gmra.mxu2 %v77_v18  ;;  %v100_v11 = vld [vmem:[%s2163_s21 + $0x138] sm:$0xff] }
  0x59   :  { %548 = vmatpush.msra.mxu1 %v258_v19 }
  0x5a   :  { %408 = vmatpush.msra.mxu0 %v173_v14  ;;  %v99_v14 = vld [vmem:[%s2163_s21 + $0x130] sm:$0xff] }
  0x5b   :  { %394 = vmatmul.f32.gmra.mxu0 %v84_v15  ;;  %549 = vmatpush.msra.mxu1 %v257_v22 }
  0x5c   :  { %409 = vmatpush.msra.mxu0 %v172_v17  ;;  %449 = vmatmul.f32.gmra.mxu1 %v76_v24 }
  0x5d   :  { %550 = vmatpush.msra.mxu1 %v256_v26  ;;  %510 = vmatmul.f32.gmra.mxu3 %v88_v34 }
  0x5e   :  { %410 = vmatpush.msra.mxu0 %v171_v20 }
  0x5f   :  { %551 = vmatpush.msra.mxu1 %v255_v29 }
  0x60   :  { %411 = vmatpush.msra.mxu0 %v170_v23  ;;  %481 = vmatmul.f32.gmra.mxu2 %v87_v31 }
  0x61   :  { %552 = vmatpush.msra.mxu1 %v254_v32 }
  0x62   :  { %412 = vmatpush.msra.mxu0 %v169_v27 }
  0x63   :  { %397 = vmatmul.f32.gmra.mxu0 %v94_v28  ;;  %553 = vmatpush.msra.mxu1 %v253_v35 }
  0x64   :  { %413 = vmatpush.msra.mxu0 %v168_v30  ;;  %452 = vmatmul.f32.gmra.mxu1 %v86_v37 }
  0x65   :  { %554 = vmatpush.msra.mxu1 %v252_v39  ;;  %513 = vmatmul.f32.gmra.mxu3 %v98_v47 }
  0x66   :  { %414 = vmatpush.msra.mxu0 %v167_v33  ;;  %v1878_v33 = vld [vmem:[%s2140_s4] sm:$0x3] }
  0x67   :  { %555 = vmatpush.msra.mxu1 %v251_v42  ;;  %1094 = vmatpush.msk.msra.mxu2 %vm593_vm0, %v1878_v33 }
  0x68   :  { %415 = vmatpush.msra.mxu0 %v166_v36  ;;  %484 = vmatmul.f32.gmra.mxu2 %v97_v44 }
  0x69   :  { %556 = vmatpush.msra.mxu1 %v250_v45 }
  0x6a   :  { %416 = vmatpush.msra.mxu0 %v165_v40 }
  0x6b   :  { %417 = vmatmul.f32.vlgmr.msra.gmra.mxu0 %v65_v41  ;;  %557 = vmatpush.msra.mxu1 %v249_v48 }
  0x6c   :  { %517 = vmatpush.msrb.mxu0 %v244_v43  ;;  %455 = vmatmul.f32.gmra.mxu1 %v96_v50 }
  0x6d   :  { %558 = vmatpush.msra.mxu1 %v248_v51 }
  0x6e   :  { %518 = vmatpush.msrb.mxu0 %v243_v46 }
  0x6f   :  { %559 = vmatpush.msra.mxu1 %v247_v54 }
  0x70   :  { %519 = vmatpush.msrb.mxu0 %v242_v49 }
  0x71   :  { %560 = vmatpush.msra.mxu1 %v246_v56 }
  0x72   :  { %520 = vmatpush.msrb.mxu0 %v241_v52 }
  0x73   :  { %420 = vmatmul.f32.gmra.mxu0 %v75_v53  ;;  %561 = vmatpush.msra.mxu1 %v245_v58 }
  0x74   :  { %521 = vmatpush.msrb.mxu0 %v240_v55  ;;  %562 = vmatmul.f32.vlgmr.msra.gmra.mxu1 %v70_v60 }
  0x76   :  { %522 = vmatpush.msrb.mxu0 %v239_v57 }
  0x78   :  { %523 = vmatpush.msrb.mxu0 %v238_v59 }
  0x7a   :  { %524 = vmatpush.msrb.mxu0 %v237_v61 }
  0x7b   :  { %423 = vmatmul.f32.gmra.mxu0 %v85_v62 }
  0x7c   :  { %525 = vmatpush.msrb.mxu0 %v236_v63  ;;  %565 = vmatmul.f32.gmra.mxu1 %v80_v2 }
  0x7e   :  { %526 = vmatpush.msrb.mxu0 %v235_v0 }
  0x80   :  { %527 = vmatpush.msrb.mxu0 %v234_v1 }
  0x82   :  { %528 = vmatpush.msrb.mxu0 %v233_v3 }
  0x83   :  { %426 = vmatmul.f32.gmra.mxu0 %v95_v4 }
  0x84   :  { %529 = vmatpush.msrb.mxu0 %v232_v5  ;;  %568 = vmatmul.f32.gmra.mxu1 %v90_v8 }
  0x86   :  { %530 = vmatpush.msrb.mxu0 %v231_v6  ;;  %v268_v34 = vpop.permute.xlu0 %267 }
  0x88   :  { %531 = vmatpush.msrb.mxu0 %v230_v7 }
  0x8a   :  { %532 = vmatpush.msrb.mxu0 %v229_v9 }
  0x8b   :  { %533 = vmatmul.f32.vlgmr.msrb.gmra.mxu0 %v69_v10 }
  0x8c   :  { %571 = vmatmul.f32.gmra.mxu1 %v100_v11  ;;  %v278_v48 = vpop.permute.xlu1 %277 }
  0x8e   :  { %v273_v40 = vpop.permute.xlu0 %272 }
  0x93   :  { %536 = vmatmul.f32.gmra.mxu0 %v79_v12 }
  0x94   :  { %v283_v61 = vpop.permute.xlu1 %282 }
  0x9b   :  { %539 = vmatmul.f32.gmra.mxu0 %v89_v13 }
  0xa3   :  { %542 = vmatmul.f32.gmra.mxu0 %v99_v14 }
  0xa7   :  { %v302_v15 = vpop.f32.mrf.mxu0 }
  0xa8   :  { %v303_v37 = vadd.f32 %v302_v15, %v268_v34 }
  0xa9   :  { %v331_v17 = vpop.f32.mrf.mxu1 }
  0xaa   :  { %v332_v39 = vadd.f32 %v331_v17, %v303_v37 }
  0xae   :  { %v360_v25 = vpop.f32.mrf.mxu2 }
  0xaf   :  { %v361_v41 = vadd.f32 %v360_v25, %v332_v39 }
  0xb0   :  { %v305_v16 = vpop.f32.mrf.mxu0 }
  0xb1   :  { %v306_v44 = vadd.f32 %v305_v16, %v273_v40 }
  0xb2   :  { %v334_v19 = vpop.f32.mrf.mxu1 }
  0xb3   :  { %v335_v49 = vadd.f32 %v334_v19, %v306_v44  ;;  %v672_v44 = vld [vmem:[%s2141_s7 + $0x68] sm:$0xff] }
  0xb6   :  { %v363_v28 = vpop.f32.mrf.mxu2 }
  0xb7   :  { %v364_v51 = vadd.f32 %v363_v28, %v335_v49  ;;  %v668_v49 = vld [vmem:[%s2141_s7 + $0x48] sm:$0xff] }
  0xb8   :  { %v308_v18 = vpop.f32.mrf.mxu0 }
  0xb9   :  { %v309_v54 = vadd.f32 %v308_v18, %v278_v48  ;;  %v669_v48 = vld [vmem:[%s2141_s7 + $0x50] sm:$0xff] }
  0xba   :  { %v337_v21 = vpop.f32.mrf.mxu1 }
  0xbb   :  { %v338_v60 = vadd.f32 %v337_v21, %v309_v54  ;;  %v664_v54 = vld [vmem:[%s2141_s7 + $0x28] sm:$0xff] }
  0xbe   :  { %v366_v31 = vpop.f32.mrf.mxu2 }
  0xbf   :  { %v367_v62 = vadd.f32 %v366_v31, %v338_v60 }
  0xc0   :  { %v311_v20 = vpop.f32.mrf.mxu0 }
  0xc1   :  { %v312_v3 = vadd.f32 %v311_v20, %v283_v61  ;;  %v628_v61 = vld [vmem:[%s2142_s5 + $0x8] sm:$0xff] }
  0xc2   :  { %v340_v24 = vpop.f32.mrf.mxu1 }
  0xc3   :  { %v341_v10 = vadd.f32 %v340_v24, %v312_v3 }
  0xc6   :  { %v369_v38 = vpop.f32.mrf.mxu2 }
  0xc7   :  { %v370_v13 = vadd.f32 %v369_v38, %v341_v10 }
  0xc8   :  { %v389_v22 = vpop.f32.mrf.mxu0 }
  0xc9   :  { %v390_v45 = vadd.f32 %v389_v22, %v361_v41 }
  0xd0   :  { %v392_v23 = vpop.f32.mrf.mxu0  ;;  %v505_v50 = vpop.f32.mrf.mxu3 }
  0xd1   :  { %v447_v27 = vpop.f32.mrf.mxu1  ;;  %v393_v55 = vadd.f32 %v392_v23, %v364_v51 }
  0xd3   :  { %v476_v46 = vpop.f32.mrf.mxu2 }
  0xd8   :  { %v395_v26 = vpop.f32.mrf.mxu0  ;;  %v508_v1 = vpop.f32.mrf.mxu3 }
  0xd9   :  { %v450_v30 = vpop.f32.mrf.mxu1  ;;  %v396_v4 = vadd.f32 %v395_v26, %v367_v62  ;;  %v661_v62 = vld [vmem:[%s2141_s7 + $0x10] sm:$0xff] }
  0xdb   :  { %v479_v59 = vpop.f32.mrf.mxu2 }
  0xe0   :  { %v398_v29 = vpop.f32.mrf.mxu0  ;;  %v511_v19 = vpop.f32.mrf.mxu3 }
  0xe1   :  { %v453_v35 = vpop.f32.mrf.mxu1  ;;  %v399_v17 = vadd.f32 %v398_v29, %v370_v13 }
  0xe3   :  { %v482_v12 = vpop.f32.mrf.mxu2 }
  0xe8   :  { %v418_v32 = vpop.f32.mrf.mxu0  ;;  %v514_v34 = vpop.f32.mrf.mxu3 }
  0xe9   :  { %v456_v43 = vpop.f32.mrf.mxu1  ;;  %v419_v47 = vadd.f32 %v418_v32, %v390_v45  ;;  %v671_v45 = vld [vmem:[%s2141_s7 + $0x60] sm:$0xff] }
  0xeb   :  { %v448_v52 = vadd.f32 %v447_v27, %v419_v47  ;;  %v485_v24 = vpop.f32.mrf.mxu2  ;;  %v670_v47 = vld [vmem:[%s2141_s7 + $0x58] sm:$0xff] }
  0xed   :  { %v477_v57 = vadd.f32 %v476_v46, %v448_v52  ;;  %v666_v52 = vld [vmem:[%s2141_s7 + $0x38] sm:$0xff] }
  0xef   :  { %v506_v63 = vadd.f32 %v505_v50, %v477_v57  ;;  %v667_v50 = vld [vmem:[%s2141_s7 + $0x40] sm:$0xff]  ;;  %v629_v57 = vld [vmem:[%s2142_s5 + $0x10] sm:$0xff] }
  0xf0   :  { %v421_v36 = vpop.f32.mrf.mxu0 }
  0xf1   :  { %v563_v56 = vpop.f32.mrf.mxu1  ;;  %v422_v58 = vadd.f32 %v421_v36, %v393_v55  ;;  %v630_v55 = vld [vmem:[%s2142_s5 + $0x18] sm:$0xff] }
  0xf3   :  { %v451_v0 = vadd.f32 %v450_v30, %v422_v58 }
  0xf5   :  { %v480_v6 = vadd.f32 %v479_v59, %v451_v0  ;;  %v662_v59 = vld [vmem:[%s2141_s7 + $0x18] sm:$0xff]  ;;  %v627_v0 = vld [vmem:[%s2142_s5] sm:$0xff] }
  0xf7   :  { %v509_v14 = vadd.f32 %v508_v1, %v480_v6  ;;  %v660_v1 = vld [vmem:[%s2141_s7 + $0x8] sm:$0xff] }
  0xf8   :  { %v424_v42 = vpop.f32.mrf.mxu0 }
  0xf9   :  { %v425_v7 = vadd.f32 %v424_v42, %v396_v4  ;;  %v566_v9 = vpop.f32.mrf.mxu1  ;;  %v674_v42 = vld [vmem:[%s2141_s7 + $0x78] sm:$0xff]  ;;  %v626_v4 = vld [vmem:[%s2143_s6] sm:$0xff] }
  0xfa   :  { %675 = vmatpush.msra.mxu0 %v674_v42 }
  0xfb   :  { %v454_v15 = vadd.f32 %v453_v35, %v425_v7  ;;  %v696_v7 = vld [vmem:[%s2144_s9] sm:$0xff] }
  0xfc   :  { %699 = vperm.xlu2 %1135, %v696_v7  }
  0xfd   :  { %v483_v20 = vadd.f32 %v482_v12, %v454_v15  ;;  %v727_v15 = vld [vmem:[%s2147_s10] sm:$0xff] }
  0xff   :  { %v512_v26 = vadd.f32 %v511_v19, %v483_v20 }
 0x100   :  { %v427_v53 = vpop.f32.mrf.mxu0 }
 0x101   :  { %v428_v21 = vadd.f32 %v427_v53, %v399_v17  ;;  %v569_v25 = vpop.f32.mrf.mxu1  ;;  %v665_v53 = vld [vmem:[%s2141_s7 + $0x30] sm:$0xff]  ;;  %v851_v17 = vld [vmem:[%s2149_s13 + $0x78] sm:$0xff] }
 0x102   :  { %852 = vmatpush.msrb.mxu1 %v851_v17 }
 0x103   :  { %v457_v27 = vadd.f32 %v456_v43, %v428_v21  ;;  %v673_v43 = vld [vmem:[%s2141_s7 + $0x70] sm:$0xff] }
 0x104   :  { %676 = vmatpush.msra.mxu0 %v673_v43 }
 0x105   :  { %v486_v31 = vadd.f32 %v485_v24, %v457_v27  ;;  %v848_v27 = vld [vmem:[%s2149_s13 + $0x60] sm:$0xff]  ;;  %v831_v24 = vld [vmem:[%s2148_s12 + $0x58] sm:$0xff] }
 0x106   :  { %677 = vmatpush.msra.mxu0 %v672_v44 }
 0x107   :  { %v515_v36 = vadd.f32 %v514_v34, %v486_v31  ;;  %v846_v31 = vld [vmem:[%s2149_s13 + $0x50] sm:$0xff]  ;;  %v845_v34 = vld [vmem:[%s2149_s13 + $0x48] sm:$0xff] }
 0x108   :  { %v534_v2 = vpop.f32.mrf.mxu0  ;;  %678 = vmatpush.msra.mxu0 %v671_v45 }
 0x109   :  { %v535_v5 = vadd.f32 %v534_v2, %v506_v63  ;;  %v572_v37 = vpop.f32.mrf.mxu1 }
 0x10a   :  { %679 = vmatpush.msra.mxu0 %v670_v47  ;;  %v844_v47 = vld [vmem:[%s2149_s13 + $0x40] sm:$0xff] }
 0x10b   :  { %v564_v8 = vadd.f32 %v563_v56, %v535_v5  ;;  %v663_v56 = vld [vmem:[%s2141_s7 + $0x20] sm:$0xff] }
 0x10c   :  { %680 = vmatpush.msra.mxu0 %v669_v48  ;;  %v659_v5 = vld [vmem:[%s2141_s7] sm:$0xff]  ;;  %v827_v48 = vld [vmem:[%s2148_s12 + $0x38] sm:$0xff] }
 0x10d   :  { %v575_v11 = vmax.f32 %v564_v8, 0.0  ;;  %v728_v8 = vld [vmem:[%s2145_s11] sm:$0xff] }
 0x10e   :  { %681 = vmatpush.msra.mxu0 %v668_v49  ;;  %731 = vperm.xlu2 %1135, %v728_v8   ;;  %v843_v49 = vld [vmem:[%s2149_s13 + $0x38] sm:$0xff] }
 0x10f   :  { %1095 = vmatmul.msk.f32.vlgmr.msra.gmra.mxu2 %vm580_vm1, %v575_v11 }
 0x110   :  { %v537_v16 = vpop.f32.mrf.mxu0  ;;  %682 = vmatpush.msra.mxu0 %v667_v50  ;;  %v826_v50 = vld [vmem:[%s2148_s12 + $0x30] sm:$0xff] }
 0x111   :  { %v538_v18 = vadd.f32 %v537_v16, %v509_v14  ;;  %v835_v16 = vld [vmem:[%s2148_s12 + $0x78] sm:$0xff] }
 0x112   :  { %683 = vmatpush.msra.mxu0 %v666_v52  ;;  %872 = vmatpush.msrb.mxu2 %v835_v16  ;;  %v825_v52 = vld [vmem:[%s2148_s12 + $0x28] sm:$0xff] }
 0x113   :  { %v567_v22 = vadd.f32 %v566_v9, %v538_v18  ;;  %v695_v9 = vld [vmem:[%s2146_s8] sm:$0xff]  ;;  %v834_v18 = vld [vmem:[%s2148_s12 + $0x70] sm:$0xff] }
 0x114   :  { %684 = vmatpush.msra.mxu0 %v665_v53  ;;  %873 = vmatpush.msrb.mxu2 %v834_v18  ;;  %v841_v53 = vld [vmem:[%s2149_s13 + $0x28] sm:$0xff] }
 0x115   :  { %v576_v23 = vmax.f32 %v567_v22, 0.0  ;;  %v833_v22 = vld [vmem:[%s2148_s12 + $0x68] sm:$0xff] }
 0x116   :  { %685 = vmatpush.msra.mxu0 %v664_v54  ;;  %874 = vmatpush.msrb.mxu2 %v833_v22  ;;  %v824_v54 = vld [vmem:[%s2148_s12 + $0x20] sm:$0xff] }
 0x117   :  { %1096 = vmatmul.msk.f32.gmra.mxu2 %vm580_vm1, %v576_v23  ;;  %v849_v23 = vld [vmem:[%s2149_s13 + $0x68] sm:$0xff] }
 0x118   :  { %v540_v28 = vpop.f32.mrf.mxu0  ;;  %686 = vmatpush.msra.mxu0 %v663_v56  ;;  %v823_v56 = vld [vmem:[%s2148_s12 + $0x18] sm:$0xff] }
 0x119   :  { %v541_v30 = vadd.f32 %v540_v28, %v512_v26  ;;  %v832_v26 = vld [vmem:[%s2148_s12 + $0x60] sm:$0xff]  ;;  %v847_v28 = vld [vmem:[%s2149_s13 + $0x58] sm:$0xff] }
 0x11a   :  { %687 = vmatpush.msra.mxu0 %v662_v59  ;;  %875 = vmatpush.msrb.mxu2 %v832_v26  ;;  %v838_v59 = vld [vmem:[%s2149_s13 + $0x10] sm:$0xff] }
 0x11b   :  { %v570_v32 = vadd.f32 %v569_v25, %v541_v30  ;;  %v830_v30 = vld [vmem:[%s2148_s12 + $0x50] sm:$0xff] }
 0x11c   :  { %688 = vmatpush.msra.mxu0 %v661_v62  ;;  %876 = vmatpush.msrb.mxu2 %v831_v24  ;;  %v820_v62 = vld [vmem:[%s2148_s12] sm:$0xff] }
 0x11d   :  { %v577_v35 = vmax.f32 %v570_v32, 0.0  ;;  %v829_v32 = vld [vmem:[%s2148_s12 + $0x48] sm:$0xff] }
 0x11e   :  { %689 = vmatpush.msra.mxu0 %v660_v1  ;;  %877 = vmatpush.msrb.mxu2 %v830_v30 }
 0x11f   :  { %1097 = vmatmul.msk.f32.gmra.mxu2 %vm580_vm1, %v577_v35 }
 0x120   :  { %v543_v29 = vpop.f32.mrf.mxu0  ;;  %690 = vmatpush.msra.mxu0 %v659_v5  ;;  %878 = vmatpush.msrb.mxu2 %v829_v32 }
 0x121   :  { %v544_v38 = vadd.f32 %v543_v29, %v515_v36  ;;  %v828_v36 = vld [vmem:[%s2148_s12 + $0x40] sm:$0xff] }
 0x122   :  { %879 = vmatpush.msrb.mxu2 %v828_v36 }
 0x123   :  { %v573_v39 = vadd.f32 %v572_v37, %v544_v38 }
 0x124   :  { %880 = vmatpush.msrb.mxu2 %v827_v48  ;;  %v927_v48 = vld [vmem:[%s2151_s15 + $0x28] sm:$0xff] }
 0x125   :  { %v578_v40 = vmax.f32 %v573_v39, 0.0 }
 0x126   :  { %881 = vmatpush.msrb.mxu2 %v826_v50  ;;  %v929_v50 = vld [vmem:[%s2151_s15 + $0x38] sm:$0xff] }
 0x127   :  { %1098 = vmatmul.msk.f32.gmra.mxu2 %vm580_vm1, %v578_v40 }
 0x128   :  { %882 = vmatpush.msrb.mxu2 %v825_v52 }
 0x12a   :  { %883 = vmatpush.msrb.mxu2 %v824_v54 }
 0x12c   :  { %884 = vmatpush.msrb.mxu2 %v823_v56 }
 0x156   :  { %v700_v11 = vpop.permute.xlu2 %699 }
 0x168   :  { %v732_v19 = vpop.permute.xlu2 %731 }
 0x192   :  { %v614_v41 = vpop.f32.mrf.mxu2 }
 0x193   :  { %v631_v3 = vmul.f32 %v627_v0, %v614_v41  ;;  %v1156_v0 = vmov 8.0  }
 0x19a   :  { %v617_v46 = vpop.f32.mrf.mxu2 }
 0x19b   :  { %v632_v2 = vmul.f32 %v628_v61, %v617_v46  ;;  %v837_v61 = vld [vmem:[%s2149_s13 + $0x8] sm:$0xff] }
 0x1a2   :  { %v620_v51 = vpop.f32.mrf.mxu2 }
 0x1a3   :  { %v633_v63 = vmul.f32 %v629_v57, %v620_v51  ;;  %v842_v51 = vld [vmem:[%s2149_s13 + $0x30] sm:$0xff]  ;;  %v839_v57 = vld [vmem:[%s2149_s13 + $0x18] sm:$0xff] }
 0x1aa   :  { %v623_v58 = vpop.f32.mrf.mxu2 }
 0x1ab   :  { %v634_v60 = vmul.f32 %v630_v55, %v623_v58  ;;  %v840_v55 = vld [vmem:[%s2149_s13 + $0x20] sm:$0xff]  ;;  %v822_v58 = vld [vmem:[%s2148_s12 + $0x10] sm:$0xff] }
 0x1ac   :  { %885 = vmatpush.msrb.mxu2 %v822_v58 }
 0x1ad   :  { %651 = vmatpush.msrb.mxu3 %v634_v60  ;;  %v821_v60 = vld [vmem:[%s2148_s12 + $0x8] sm:$0xff]  ;;  %s1163_s12 = smov 120  }
 0x1ae   :  { %886 = vmatpush.msrb.mxu2 %v821_v60 }
 0x1af   :  { %652 = vmatpush.msrb.mxu3 %v633_v63  ;;  %v836_v63 = vld [vmem:[%s2149_s13] sm:$0xff] }
 0x1b0   :  { %887 = vmatpush.msrb.mxu2 %v820_v62 }
 0x1b1   :  { %653 = vmatpush.msrb.mxu3 %v632_v2 }
 0x1b3   :  { %654 = vmatpush.msrb.mxu3 %v631_v3 }
 0x1b4   :  { %1099 = vmatmul.msk.f32.vlgmr.msrb.gmra.mxu3 %vm635_vm2, %v626_v4 }
 0x237   :  { %v1949_v6 = vpop.f32.mrf.mxu3 }
 0x238   :  { %691 = vmatmul.f32.vlgmr.msra.gmra.mxu0 %v1949_v6 }
 0x2b5   :  { %v692_v10 = vpop.f32.mrf.mxu0 }
 0x2b6   :  { %721 = vmatpush.msra.mxu3 %v692_v10 }
 0x2b7   :  { %1100 = vmatmul.msk.f32.vlgmr.msra.gmra.mxu3 %vm702_vm3, %v695_v9 }
 0x33a   :  { %v723_v12 = vpop.f32.mrf.mxu3 }
 0x33b   :  { %v724_v13 = vadd.f32 %v723_v12, %v700_v11 }
 0x33d   :  { %v726_v14 = vmax.f32 %v724_v13, 0.0 }
 0x33f   :  { %752 = vmatpush.msrb.mxu3 %v726_v14 }
 0x340   :  { %1101 = vmatmul.msk.f32.vlgmr.msrb.gmra.mxu3 %vm702_vm3, %v727_v15 }
 0x341   :  { %1103 = vmatpush.msk.msra.mxu3 %vm593_vm0, %v1878_v33  ;;  %v850_v33 = vld [vmem:[%s2149_s13 + $0x70] sm:$0xff]  ;;  %s1164_s13 = smov 119  }
 0x342   :  { %853 = vmatpush.msrb.mxu1 %v850_v33 }
 0x344   :  { %854 = vmatpush.msrb.mxu1 %v849_v23 }
 0x346   :  { %855 = vmatpush.msrb.mxu1 %v848_v27 }
 0x348   :  { %856 = vmatpush.msrb.mxu1 %v847_v28 }
 0x34a   :  { %857 = vmatpush.msrb.mxu1 %v846_v31 }
 0x34c   :  { %858 = vmatpush.msrb.mxu1 %v845_v34 }
 0x34e   :  { %859 = vmatpush.msrb.mxu1 %v844_v47  ;;  %v926_v47 = vld [vmem:[%s2151_s15 + $0x20] sm:$0xff] }
 0x350   :  { %860 = vmatpush.msrb.mxu1 %v843_v49  ;;  %v928_v49 = vld [vmem:[%s2151_s15 + $0x30] sm:$0xff] }
 0x352   :  { %861 = vmatpush.msrb.mxu1 %v842_v51  ;;  %v930_v51 = vld [vmem:[%s2151_s15 + $0x40] sm:$0xff] }
 0x354   :  { %862 = vmatpush.msrb.mxu1 %v841_v53 }
 0x356   :  { %863 = vmatpush.msrb.mxu1 %v840_v55 }
 0x358   :  { %864 = vmatpush.msrb.mxu1 %v839_v57 }
 0x35a   :  { %865 = vmatpush.msrb.mxu1 %v838_v59  ;;  %v1081_v59 = vld [vmem:[%s2153_s16] sm:$0xff] }
 0x35c   :  { %866 = vmatpush.msrb.mxu1 %v837_v61 }
 0x35e   :  { %867 = vmatpush.msrb.mxu1 %v836_v63  ;;  %v1137_v63 = vld [vmem:[%s2152_s17] ss:$0 sm:$0xff] }
 0x3c3   :  { %v754_v20 = vpop.f32.mrf.mxu3 }
 0x3c4   :  { %v755_v21 = vadd.f32 %v754_v20, %v732_v19 }
 0x3c6   :  { %v1102_v25 = vmul.f32 -1.442695, %v755_v21  ;;  %v896_v21 = vpop.permute.xlu0 %895 }
 0x3c8   :  { %1145 = vpow2.f32 %v1102_v25  ;;  %v898_v25 = vperm.slane %v896_v21, 0  ;;  %v1143_v21 = vld [vmem:[%s2152_s17 + $0x7] ss:$0 sm:$0xff] }
 0x3ce   :  { %v1146_v35 = vpop.eup %1145 }
 0x3cf   :  { %v760_v29 = vadd.f32 1.0, %v1146_v35 }
 0x3d1   :  { %1147 = vrcp.f32 %v760_v29  ;;  %v772_v40 = vand.u32 2147483648, %v760_v29  ;;  %v770_v42 = vand.u32 2147483647, %v760_v29  ;;  %vm766_vm5 = vweird.f32 %v760_v29 }
 0x3d2   :  { %1149 = vrcp.f32 %v1156_v0  ;;  %v1138_v0 = vld [vmem:[%s2152_s17 + $0x1] ss:$0 sm:$0xff] }
 0x3d3   :  { %v773_v44 = vor.u32 1.1754944e-38, %v772_v40  ;;  %vm771_vm7 = vcmp.eq.f32.partialorder %v770_v42, 8.507059e+37 }
 0x3d7   :  { %v1148_v37 = vpop.eup %1147 }
 0x3d8   :  { %v762_v38 = vmul.f32 %v1148_v37, %v760_v29  ;;  %vm767_vm4 = vweird.f32 %v1148_v37  ;;  %v1150_v1 = vpop.eup %1149 }
 0x3d9   :  { %vm768_vm6 = vmor %vm766_vm5, %vm767_vm4  ;;  %v813_v2 = vmul.f32 8.0, %v1150_v1  ;;  %vm817_vm8 = vweird.f32 %v1150_v1 }
 0x3da   :  { %v763_v39 = vsub.f32 1.0, %v762_v38 }
 0x3db   :  { %v814_v4 = vsub.f32 1.0, %v813_v2 }
 0x3dc   :  { %v764_v41 = vmul.f32 %v1148_v37, %v763_v39 }
 0x3dd   :  { %v815_v8 = vmul.f32 %v1150_v1, %v814_v4 }
 0x3de   :  { %v765_v43 = vadd.f32 %v1148_v37, %v764_v41 }
 0x3df   :  { %v816_v13 = vadd.f32 %v1150_v1, %v815_v8 }
 0x3e0   :  { %v769_v45 = vsel %vm768_vm6, %v1148_v37, %v765_v43  ;;  %v922_v43 = vld [vmem:[%s2151_s15] sm:$0xff] }
 0x3e1   :  { %v774_v46 = vsel %vm771_vm7, %v773_v44, %v769_v45  ;;  %v818_v18 = vsel %vm817_vm8, %v1150_v1, %v816_v13  ;;  %v923_v44 = vld [vmem:[%s2151_s15 + $0x8] sm:$0xff]  ;;  %v924_v45 = vld [vmem:[%s2151_s15 + $0x10] sm:$0xff]  ;;  %v1139_v1 = vld [vmem:[%s2152_s17 + $0x2] ss:$0 sm:$0xff] }
 0x3e2   :  { %1104 = vmatmul.msk.f32.vlgmr.msra.gmra.mxu3 %vm580_vm1, %v774_v46  ;;  %v925_v46 = vld [vmem:[%s2151_s15 + $0x18] sm:$0xff]  ;;  %s1162_s15 = smov 121  }
 0x465   :  { %v796_v3 = vpop.f32.mrf.mxu3 }
 0x466   :  { %v799_v5 = vmul.f32 %v796_v3, %v1949_v6  ;;  %v921_v6 = vld [vmem:[%s2150_s1] sm:$0xff] }
 0x467   :  { %973 = vmatpush.msrb.mxu3 %v921_v6 }
 0x468   :  { %v800_v7 = vrot.slane %v799_v5, 4 }
 0x46a   :  { %v801_v9 = vmax.f32 %v799_v5, %v800_v7  ;;  %v807_v10 = vadd.f32 %v800_v7, %v799_v5 }
 0x46c   :  { %v802_v11 = vrot.slane %v801_v9, 2  ;;  %v808_v12 = vrot.slane %v807_v10, 2 }
 0x46e   :  { %v809_v14 = vadd.f32 %v808_v12, %v807_v10  ;;  %v803_v15 = vmax.f32 %v801_v9, %v802_v11  ;;  %v1136_v12 = vld [vmem:[%s2152_s17 + $0x4] ss:$0 sm:$0xff] }
 0x470   :  { %v804_v16 = vrot.slane %v803_v15, 1  ;;  %v810_v17 = vrot.slane %v809_v14, 1 }
 0x472   :  { %v805_v19 = vmax.f32 %v803_v15, %v804_v16  ;;  %v811_v20 = vadd.f32 %v810_v17, %v809_v14  ;;  %v1141_v17 = vld [vmem:[%s2152_s17 + $0x5] ss:$0 sm:$0xff] }
 0x474   :  { %888 = vmatmul.f32.vlgmr.msrb.gmra.mxu2 %v805_v19  ;;  %v819_v33 = vmul.f32 %v818_v18, %v811_v20  ;;  %v1142_v18 = vld [vmem:[%s2152_s17 + $0x6] ss:$0 sm:$0xff] }
 0x476   :  { %868 = vmatmul.f32.vlgmr.msrb.gmra.mxu1 %v819_v33 }
 0x4f3   :  { %v869_v22 = vpop.f32.mrf.mxu1 }
 0x4f7   :  { %v889_v23 = vpop.f32.mrf.mxu2 }
 0x4f8   :  { %v890_v26 = vadd.f32 %v889_v23, %v869_v22  ;;  %v1144_v22 = vld [vmem:[%s2152_s17 + $0x8] ss:$0 sm:$0xff] }
 0x4fa   :  { %v899_v27 = vadd.f32 %v898_v25, %v890_v26 }
 0x4fc   :  { %v1105_v24 = vmul.f32 -1.442695, %v899_v27 }
 0x4fe   :  { %1151 = vpow2.f32 %v1105_v24 }
 0x504   :  { %v1152_v28 = vpop.eup %1151 }
 0x505   :  { %v903_v30 = vadd.f32 1.0, %v1152_v28 }
 0x507   :  { %1153 = vrcp.f32 %v903_v30  ;;  %v915_v35 = vand.u32 2147483648, %v903_v30  ;;  %v913_v29 = vand.u32 2147483647, %v903_v30  ;;  %vm909_vm10 = vweird.f32 %v903_v30 }
 0x509   :  { %v916_v38 = vor.u32 1.1754944e-38, %v915_v35  ;;  %vm914_vm12 = vcmp.eq.f32.partialorder %v913_v29, 8.507059e+37 }
 0x50d   :  { %v1154_v31 = vpop.eup %1153 }
 0x50e   :  { %v905_v32 = vmul.f32 %v1154_v31, %v903_v30  ;;  %vm910_vm9 = vweird.f32 %v1154_v31 }
 0x50f   :  { %vm911_vm11 = vmor %vm909_vm10, %vm910_vm9 }
 0x510   :  { %v906_v34 = vsub.f32 1.0, %v905_v32 }
 0x512   :  { %v907_v36 = vmul.f32 %v1154_v31, %v906_v34 }
 0x514   :  { %v908_v37 = vadd.f32 %v1154_v31, %v907_v36 }
 0x516   :  { %v912_v39 = vsel %vm911_vm11, %v1154_v31, %v908_v37 }
 0x517   :  { %v917_v40 = vsel %vm914_vm12, %v916_v38, %v912_v39 }
 0x518   :  { %v919_v41 = vperm.slane %v917_v40, 0 }
 0x51a   :  { %v920_v42 = vmul.f32 %v919_v41, %v799_v5  ;;  %v1140_v5 = vld [vmem:[%s2152_s17 + $0x3] ss:$0 sm:$0xff] }
 0x51c   :  { %974 = vmatpush.msrb.mxu3 %v920_v42 }
 0x51d   :  { %1106 = vmatmul.msk.f32.vlgmr.msrb.gmra.mxu3 %vm931_vm13, %v922_v43 }
 0x525   :  { %1107 = vmatmul.msk.f32.gmra.mxu3 %vm931_vm13, %v923_v44 }
 0x52d   :  { %1108 = vmatmul.msk.f32.gmra.mxu3 %vm931_vm13, %v924_v45 }
 0x535   :  { %1109 = vmatmul.msk.f32.gmra.mxu3 %vm931_vm13, %v925_v46 }
 0x53d   :  { %1110 = vmatmul.msk.f32.gmra.mxu3 %vm931_vm13, %v926_v47 }
 0x545   :  { %1111 = vmatmul.msk.f32.gmra.mxu3 %vm931_vm13, %v927_v48 }
 0x54d   :  { %1112 = vmatmul.msk.f32.gmra.mxu3 %vm931_vm13, %v928_v49 }
 0x555   :  { %1113 = vmatmul.msk.f32.gmra.mxu3 %vm931_vm13, %v929_v50 }
 0x55d   :  { %1114 = vmatmul.msk.f32.gmra.mxu3 %vm931_vm13, %v930_v51 }
 0x5a0   :  { %v976_v52 = vpop.f32.mrf.mxu3 }
 0x5a1   :  { %1003 = vrot.lane.b32.xlu1 %v976_v52, %s1157_s26 }
 0x5a8   :  { %v979_v53 = vpop.f32.mrf.mxu3 }
 0x5a9   :  { %1011 = vrot.lane.b32.xlu2 %v979_v53, %s1158_s14 }
 0x5b0   :  { %v982_v54 = vpop.f32.mrf.mxu3 }
 0x5b1   :  { %1020 = vrot.lane.b32.xlu0 %v982_v54, %s1159_s27 }
 0x5b8   :  { %v985_v55 = vpop.f32.mrf.mxu3 }
 0x5b9   :  { %1029 = vrot.lane.b32.xlu1 %v985_v55, %s1160_s28 }
 0x5c0   :  { %v988_v56 = vpop.f32.mrf.mxu3 }
 0x5c1   :  { %v1043_v16 = vmul.f32 %v1136_v12, %v988_v56 }
 0x5c8   :  { %v991_v57 = vpop.f32.mrf.mxu3 }
 0x5c9   :  { %1045 = vrot.lane.b32.xlu2 %v991_v57, %s1161_s30 }
 0x5d0   :  { %v994_v58 = vpop.f32.mrf.mxu3 }
 0x5d1   :  { %1054 = vrot.lane.b32.xlu0 %v994_v58, %s1162_s15 }
 0x5d8   :  { %v997_v60 = vpop.f32.mrf.mxu3 }
 0x5d9   :  { %1084 = vperm.xlu0 %1133, %v1081_v59   ;;  %1063 = vrot.lane.b32.xlu1 %v997_v60, %s1163_s12 }
 0x5e0   :  { %v1000_v61 = vpop.f32.mrf.mxu3 }
 0x5e1   :  { %1072 = vrot.lane.b32.xlu2 %v1000_v61, %s1164_s13 }
 0x603   :  { %v1012_v2 = vpop.permute.xlu2 %1011 }
 0x604   :  { %v1018_v8 = vmul.f32 %v1138_v0, %v1012_v2 }
 0x613   :  { %v1004_v62 = vpop.permute.xlu1 %1003 }
 0x614   :  { %v1009_v4 = vmul.f32 %v1137_v63, %v1004_v62 }
 0x616   :  { %v1019_v10 = vadd.f32 %v1018_v8, %v1009_v4 }
 0x623   :  { %v1021_v3 = vpop.permute.xlu0 %1020  ;;  %v1046_v14 = vpop.permute.xlu2 %1045 }
 0x624   :  { %v1027_v9 = vmul.f32 %v1139_v1, %v1021_v3  ;;  %v1052_v33 = vmul.f32 %v1141_v17, %v1046_v14 }
 0x626   :  { %v1028_v13 = vadd.f32 %v1027_v9, %v1019_v10 }
 0x62b   :  { %v1030_v7 = vpop.permute.xlu1 %1029 }
 0x62c   :  { %v1036_v11 = vmul.f32 %v1140_v5, %v1030_v7 }
 0x62e   :  { %v1037_v15 = vadd.f32 %v1036_v11, %v1028_v13 }
 0x630   :  { %v1044_v20 = vadd.f32 %v1043_v16, %v1037_v15 }
 0x632   :  { %v1053_v25 = vadd.f32 %v1052_v33, %v1044_v20 }
 0x63b   :  { %v1073_v23 = vpop.permute.xlu2 %1072 }
 0x63c   :  { %v1079_v28 = vmul.f32 %v1144_v22, %v1073_v23 }
 0x643   :  { %v1055_v19 = vpop.permute.xlu0 %1054 }
 0x644   :  { %v1061_v6 = vmul.f32 %v1142_v18, %v1055_v19 }
 0x646   :  { %v1062_v27 = vadd.f32 %v1061_v6, %v1053_v25 }
 0x64b   :  { %v1064_v26 = vpop.permute.xlu1 %1063  ;;  %v1085_v32 = vpop.permute.xlu0 %1084 }
 0x64c   :  { %v1070_v24 = vmul.f32 %v1143_v21, %v1064_v26 }
 0x64e   :  { %v1071_v30 = vadd.f32 %v1070_v24, %v1062_v27 }
 0x650   :  { %v1080_v31 = vadd.f32 %v1079_v28, %v1071_v30 }
 0x652   :  { %v1087_v34 = vadd.f32 %v1085_v32, %v1080_v31 }
 0x654   :  { %v1088_v35 = vmax.f32 %v1087_v34, 0.0 }
 0x656   :  { %1089 = vst [vmem:[%s2154_s18] sm:$0xff] %v1088_v35 }

</bundles_post_ra>
